<compile_context>
chip_gen: v7x
topology: tpu7x:2x2x1
jax: 0.10.0
libtpu: 0.0.40
codegen_flags: <defaults>
</compile_context>

<pallas_src>
import functools

import numpy as np

import jax
import jax.numpy as jnp
from jax.experimental import pallas as pl
from jax.experimental.pallas import tpu as pltpu


_BN_EPS = 1e-5


def _rup(x, m):
    return ((x + m - 1) // m) * m


def _stage_dims(B, H, W):
    """Flat-layout plan for one conv stage operating on an (H, W) map."""
    Hp, Wp = H + 2, W + 2                  # spatially zero-padded grid
    M = B * Hp * Wp                        # flat positions (incl. padding ring)
    M_pad = _rup(M, 128)                   # lane-dense width
    pad_flat = Wp + 1                      # flat extension so taps never read OOB
    return dict(H=H, W=W, Hp=Hp, Wp=Wp, M=M, M_pad=M_pad,
                pad_flat=pad_flat, Mtot=M_pad + 2 * pad_flat,
                cnt=float(B * H * W))


# ----------------------------------------------------------------------------
# Pallas kernels
# ----------------------------------------------------------------------------
def _conv_bn(xflat, w, bgb, mask, *, Wp, M_pad, cnt, relu):
    """3x3/pad=1 conv (single tap-stacked GEMM) + bias + train-mode BN [+ReLU].

    xflat: (Cin_p, Mtot)      flat, spatially padded, zero-extended input
    w:     (Cout_p, 9*Cin_p)  tap-stacked weights, col = (ky*3+kx)*Cin_p + ci
    bgb:   (Cout_p, 3)        [conv bias | BN gamma | BN beta]
    mask:  (1, M_pad)         1.0 at valid (interior, < M) flat positions
    """
    taps = [xflat[:, ky * Wp + kx: ky * Wp + kx + M_pad]
            for ky in range(3) for kx in range(3)]
    stack = jnp.concatenate(taps, axis=0)                     # (9*Cin_p, M_pad)
    acc = jnp.dot(w, stack, preferred_element_type=jnp.float32) + bgb[:, 0:1]

    # single-pass masked batch statistics (biased variance, PyTorch train mode)
    inv = 1.0 / cnt
    ex = jnp.sum(acc * mask, axis=1, keepdims=True) * inv
    ex2 = jnp.sum((acc * acc) * mask, axis=1, keepdims=True) * inv
    var = jnp.maximum(ex2 - ex * ex, 0.0)
    y = (acc - ex) * jax.lax.rsqrt(var + _BN_EPS) * bgb[:, 1:2] + bgb[:, 2:3]
    if relu:
        y = jnp.maximum(y, 0.0)
    return y


def _branch_kernel(x_ref, w1_ref, bgb1_ref, w2_ref, bgb2_ref, w3_ref, bgb3_ref,
                   pool1_ref, pool2_ref, pool3_ref, mask_ref, feat_ref,
                   *, d1, d2, d3):
    """One full conv branch (3x conv+BN[+ReLU], pools, flatten) per grid step.

    Pools / re-padding / flatten are constant right-matmuls on the flat lane
    axis (pool*_ref), so the whole branch stays in VMEM end-to-end.
    """
    mask = mask_ref[...]

    y1 = _conv_bn(x_ref[...], w1_ref[...], bgb1_ref[...],
                  mask[0:1, :d1["M_pad"]], Wp=d1["Wp"], M_pad=d1["M_pad"],
                  cnt=d1["cnt"], relu=True)
    x2 = jnp.dot(y1, pool1_ref[...], preferred_element_type=jnp.float32)

    y2 = _conv_bn(x2, w2_ref[...], bgb2_ref[...],
                  mask[1:2, :d2["M_pad"]], Wp=d2["Wp"], M_pad=d2["M_pad"],
                  cnt=d2["cnt"], relu=True)
    x3 = jnp.dot(y2, pool2_ref[...], preferred_element_type=jnp.float32)

    y3 = _conv_bn(x3, w3_ref[...], bgb3_ref[...],
                  mask[2:3, :d3["M_pad"]], Wp=d3["Wp"], M_pad=d3["M_pad"],
                  cnt=d3["cnt"], relu=False)
    # AvgPool(2,1) + flatten -> per-branch feature slab, 128-lane dense output
    feat_ref[...] = jnp.dot(y3, pool3_ref[...], preferred_element_type=jnp.float32)


def _fc_kernel(feat_ref, w1_ref, b1_ref, w2_ref, b2_ref, o_ref, *, B):
    """combined = x_feat + y_feat; h = relu(W1r @ z + b1); out = w2.h + b2."""
    z = feat_ref[0] + feat_ref[1]                        # (C3_p, NPOOL_PAD)
    # feature lanes are s*B + b (s = spatial 0..3); regroup to rows s*C3_p + c
    zs = jnp.concatenate([z[:, s * B:(s + 1) * B] for s in range(4)], axis=0)
    h = jnp.dot(w1_ref[...], zs, preferred_element_type=jnp.float32) + b1_ref[...]
    h = jnp.maximum(h, 0.0)                              # (I_p, B)
    # final inter->1 layer: VPU multiply + sublane reduce (no 1-lane matmul)
    o_ref[...] = jnp.sum(h * w2_ref[...], axis=0, keepdims=True) + b2_ref[...]


# ----------------------------------------------------------------------------
# Trace-time constants: pooling matrices and BN interior masks
# ----------------------------------------------------------------------------
def _pool_s2_matrix(B, din, dout):
    """(din.M_pad, dout.Mtot): AvgPool2d(2,2) + zero ring re-pad + flat ext."""
    P = np.zeros((din["M_pad"], dout["Mtot"]), np.float32)
    for b in range(B):
        for i in range(dout["H"]):
            for j in range(dout["W"]):
                col = (dout["pad_flat"] + b * dout["Hp"] * dout["Wp"]
                       + (i + 1) * dout["Wp"] + (j + 1))
                for dy in range(2):
                    for dx in range(2):
                        row = (b * din["Hp"] * din["Wp"]
                               + (1 + 2 * i + dy) * din["Wp"] + (1 + 2 * j + dx))
                        P[row, col] = 0.25
    return P


def _pool_s1_flatten_matrix(B, din, npool_pad):
    """(din.M_pad, npool_pad): AvgPool2d(2,1) + flatten to lanes s*B + b."""
    Hh, Ww = din["H"] - 1, din["W"] - 1
    P = np.zeros((din["M_pad"], npool_pad), np.float32)
    for b in range(B):
        for i in range(Hh):
            for j in range(Ww):
                col = (i * Ww + j) * B + b
                for dy in range(2):
                    for dx in range(2):
                        row = (b * din["Hp"] * din["Wp"]
                               + (1 + i + dy) * din["Wp"] + (1 + j + dx))
                        P[row, col] = 0.25
    return P


def _mask_pack(B, dims):
    """(n_stages, max M_pad): 1.0 at valid interior flat positions per stage."""
    width = max(d["M_pad"] for d in dims)
    m = np.zeros((len(dims), width), np.float32)
    for k, d in enumerate(dims):
        for b in range(B):
            for r in range(1, d["Hp"] - 1):
                for c in range(1, d["Wp"] - 1):
                    m[k, b * d["Hp"] * d["Wp"] + r * d["Wp"] + c] = 1.0
    return m


# ----------------------------------------------------------------------------
# One-time parameter layout (hoisted out of the per-forward trace)
# ----------------------------------------------------------------------------
def _pad_col(v, n):
    v = jnp.asarray(v, jnp.float32).reshape(-1, 1)
    return jnp.pad(v, ((0, n - v.shape[0]), (0, 0)))


def _conv_weight_flat(w, cout_p, cin_p):
    """(Cout,Cin,3,3) -> (Cout_p, 9*Cin_p), col = (ky*3+kx)*Cin_p + ci."""
    cout, cin = w.shape[0], w.shape[1]
    wp = jnp.pad(jnp.asarray(w, jnp.float32),
                 ((0, cout_p - cout), (0, cin_p - cin), (0, 0), (0, 0)))
    return jnp.transpose(wp, (0, 2, 3, 1)).reshape(cout_p, 9 * cin_p)


def prepare_params(params, *, in_ch_x, in_ch_y, inter):
    def chans(cin):
        return cin, max(cin // 2, inter), max(cin // 4, inter), inter

    cx, cy = chans(in_ch_x), chans(in_ch_y)
    c0p, c1p, c2p, c3p = (_rup(max(a, b), 8) for a, b in zip(cx, cy))

    def branch(p):
        return dict(
            w1=_conv_weight_flat(p["w1"], c1p, c0p),
            bgb1=jnp.concatenate([_pad_col(p["b1"], c1p), _pad_col(p["g1"], c1p),
                                  _pad_col(p["be1"], c1p)], axis=1),
            w2=_conv_weight_flat(p["w2"], c2p, c1p),
            bgb2=jnp.concatenate([_pad_col(p["b2"], c2p), _pad_col(p["g2"], c2p),
                                  _pad_col(p["be2"], c2p)], axis=1),
            w3=_conv_weight_flat(p["w3"], c3p, c2p),
            bgb3=jnp.concatenate([_pad_col(p["b3"], c3p), _pad_col(p["g3"], c3p),
                                  _pad_col(p["be3"], c3p)], axis=1),
        )

    bx, by = branch(params["conv_x"]), branch(params["conv_y"])
    conv = {k: jnp.stack([bx[k], by[k]], axis=0) for k in bx}   # (2, ...)

    # FC head: rearrange W1 so its contraction rows match the zstack layout
    # (row = s*c3p + c), where PyTorch's flattened feature index is c*4 + s.
    inter_p = _rup(inter, 8)
    w1 = jnp.asarray(params["fc"]["w1"], jnp.float32)           # (4*inter, inter)
    w1t = jnp.transpose(w1).reshape(inter, inter, 4)            # [i, c, s]
    w1t = jnp.pad(w1t, ((0, inter_p - inter), (0, c3p - inter), (0, 0)))
    w1r = jnp.transpose(w1t, (0, 2, 1)).reshape(inter_p, 4 * c3p)
    fc = dict(w1=w1r,
              b1=_pad_col(params["fc"]["b1"].reshape(-1), inter_p),
              w2=_pad_col(params["fc"]["w2"].reshape(-1), inter_p),
              b2=jnp.asarray(params["fc"]["b2"], jnp.float32).reshape(1, 1))
    return dict(conv=conv, fc=fc)


# ----------------------------------------------------------------------------
# Forward
# ----------------------------------------------------------------------------
def _prep_input(x_nchw, c0p, d):
    """NCHW -> (c0p, Mtot) flat, spatially padded, zero-extended layout."""
    B, C, _, _ = x_nchw.shape
    x = jnp.transpose(x_nchw, (1, 0, 2, 3)).astype(jnp.float32)   # (C, B, H, W)
    x = jnp.pad(x, ((0, c0p - C), (0, 0), (1, 1), (1, 1)))        # (c0p,B,Hp,Wp)
    xf = x.reshape(c0p, B * d["Hp"] * d["Wp"])
    return jnp.pad(xf, ((0, 0), (d["pad_flat"],
                                 d["Mtot"] - d["pad_flat"] - xf.shape[1])))


def mine_forward(x_nchw, y_nchw, prepped):
    B, _, H, W = x_nchw.shape
    assert H % 4 == 0 and W % 4 == 0 and (H // 4 - 1) * (W // 4 - 1) == 4, \
        "MINE head hard-codes conv_output_size = 4*inter (needs a final 2x2 map)"

    conv, fc = prepped["conv"], prepped["fc"]
    c0p = conv["w1"].shape[2] // 9
    c3p = conv["w3"].shape[1]

    d1 = _stage_dims(B, H, W)
    d2 = _stage_dims(B, H // 2, W // 2)
    d3 = _stage_dims(B, H // 4, W // 4)
    npool_pad = _rup(4 * B, 128)

    # constants baked at trace time (shared by both branches)
    pool1 = _pool_s2_matrix(B, d1, d2)
    pool2 = _pool_s2_matrix(B, d2, d3)
    pool3 = _pool_s1_flatten_matrix(B, d3, npool_pad)
    maskp = _mask_pack(B, (d1, d2, d3))

    xs = jnp.stack([_prep_input(x_nchw, c0p, d1),
                    _prep_input(y_nchw, c0p, d1)], axis=0)        # (2, c0p, Mtot)

    def bspec(shape):        # per-branch block (leading branch dim squeezed)
        nd = len(shape) - 1
        return pl.BlockSpec((None,) + tuple(shape[1:]), lambda i: (i,) + (0,) * nd)

    def shared(shape):       # same block for both grid steps
        nd = len(shape)
        return pl.BlockSpec(tuple(shape), lambda i: (0,) * nd)

    feats = pl.pallas_call(
        functools.partial(_branch_kernel, d1=d1, d2=d2, d3=d3),
        out_shape=jax.ShapeDtypeStruct((2, c3p, npool_pad), jnp.float32),
        grid=(2,),                                    # one grid step per branch
        in_specs=[
            bspec(xs.shape),
            bspec(conv["w1"].shape), bspec(conv["bgb1"].shape),
            bspec(conv["w2"].shape), bspec(conv["bgb2"].shape),
            bspec(conv["w3"].shape), bspec(conv["bgb3"].shape),
            shared(pool1.shape), shared(pool2.shape), shared(pool3.shape),
            shared(maskp.shape),
        ],
        out_specs=bspec((2, c3p, npool_pad)),
        compiler_params=pltpu.CompilerParams(dimension_semantics=("parallel",)),
    )(xs, conv["w1"], conv["bgb1"], conv["w2"], conv["bgb2"],
      conv["w3"], conv["bgb3"], pool1, pool2, pool3, maskp)

    out = pl.pallas_call(
        functools.partial(_fc_kernel, B=B),
        out_shape=jax.ShapeDtypeStruct((1, B), jnp.float32),
    )(feats, fc["w1"], fc["b1"], fc["w2"], fc["b2"])
    return jnp.transpose(out)                         # (B, 1)


# ----------------------------------------------------------------------------
# Pure-JAX reference (train-mode BN, same math as the PyTorch module)
# ----------------------------------------------------------------------------
def _ref_forward(x, y, params):
    def conv_bn(h, w, b, g, be, relu):
        o = jax.lax.conv_general_dilated(h, w, (1, 1), ((1, 1), (1, 1)),
                                         dimension_numbers=("NCHW", "OIHW", "NCHW"))
        o = o + b.reshape(1, -1, 1, 1)
        mean = o.mean(axis=(0, 2, 3), keepdims=True)
        var = ((o - mean) ** 2).mean(axis=(0, 2, 3), keepdims=True)
        o = (o - mean) * jax.lax.rsqrt(var + _BN_EPS)
        o = o * g.reshape(1, -1, 1, 1) + be.reshape(1, -1, 1, 1)
        return jnp.maximum(o, 0.0) if relu else o

    def pool2(h):
        b_, c_, hh, ww = h.shape
        return h.reshape(b_, c_, hh // 2, 2, ww // 2, 2).mean(axis=(3, 5))

    def pool1(h):
        return 0.25 * (h[:, :, :-1, :-1] + h[:, :, :-1, 1:]
                       + h[:, :, 1:, :-1] + h[:, :, 1:, 1:])

    def branch(h, p):
        h = conv_bn(h, p["w1"], p["b1"], p["g1"], p["be1"], True)
        h = pool2(h)
        h = conv_bn(h, p["w2"], p["b2"], p["g2"], p["be2"], True)
        h = pool2(h)
        h = conv_bn(h, p["w3"], p["b3"], p["g3"], p["be3"], False)
        h = pool1(h)
        return h.reshape(h.shape[0], -1)

    comb = branch(x, params["conv_x"]) + branch(y, params["conv_y"])
    hid = jnp.maximum(comb @ params["fc"]["w1"] + params["fc"]["b1"], 0.0)
    return hid @ params["fc"]["w2"] + params["fc"]["b2"]


# ----------------------------------------------------------------------------
# Deterministic parameter construction (unchanged)
# ----------------------------------------------------------------------------
def _branch_params(key, cin, inter):
    c1 = max(cin // 2, inter)
    c2 = max(cin // 4, inter)
    ks = jax.random.split(key, 6)
    return {
        "w1": 0.1 * jax.random.normal(ks[0], (c1, cin, 3, 3), jnp.float32),
        "b1": 0.1 * jax.random.normal(ks[1], (c1,), jnp.float32),
        "g1": jnp.ones((c1,), jnp.float32), "be1": jnp.zeros((c1,), jnp.float32),
        "w2": 0.1 * jax.random.normal(ks[2], (c2, c1, 3, 3), jnp.float32),
        "b2": 0.1 * jax.random.normal(ks[3], (c2,), jnp.float32),
        "g2": jnp.ones((c2,), jnp.float32), "be2": jnp.zeros((c2,), jnp.float32),
        "w3": 0.1 * jax.random.normal(ks[4], (inter, c2, 3, 3), jnp.float32),
        "b3": 0.1 * jax.random.normal(ks[5], (inter,), jnp.float32),
        "g3": jnp.ones((inter,), jnp.float32), "be3": jnp.zeros((inter,), jnp.float32),
    }


def make_params(key, in_ch_x, in_ch_y, inter):
    kx, ky, k1, k2, k3, k4 = jax.random.split(key, 6)
    conv_out = 4 * inter
    return {
        "conv_x": _branch_params(kx, in_ch_x, inter),
        "conv_y": _branch_params(ky, in_ch_y, inter),
        "fc": {
            # stored as (K, N) for right-multiplication: x @ W
            "w1": 0.1 * jax.random.normal(k1, (conv_out, inter), jnp.float32),
            "b1": 0.1 * jax.random.normal(k2, (1, inter), jnp.float32),
            "w2": 0.1 * jax.random.normal(k3, (inter, 1), jnp.float32),
            "b2": 0.1 * jax.random.normal(k4, (1, 1), jnp.float32),
        },
    }


if __name__ == "__main__":
    # conv_output_size = 4*inter requires a final 2x2 spatial map => input 12x12
    B, IN_X, IN_Y, INTER, H, W = 2, 4, 4, 8, 12, 12

    root = jax.random.PRNGKey(0)
    kp, kx, ky = jax.random.split(root, 3)
    params = make_params(kp, IN_X, IN_Y, INTER)
    prepped = prepare_params(params, in_ch_x=IN_X, in_ch_y=IN_Y, inter=INTER)

    x = jax.random.normal(kx, (B, IN_X, H, W), jnp.float32)   # NCHW like PyTorch
    y = jax.random.normal(ky, (B, IN_Y, H, W), jnp.float32)

    out = jax.jit(mine_forward)(x, y, prepped)
    out = jax.block_until_ready(out)
    assert out.shape == (B, 1), out.shape
    assert bool(jnp.all(jnp.isfinite(out)))

    ref = jax.block_until_ready(jax.jit(_ref_forward)(x, y, params))
    assert bool(jnp.allclose(out, ref, rtol=1e-3, atol=1e-3)), (out, ref)

    print("KERNEL_OK")
</pallas_src>

<mosaic_0001>
module attributes {stable_mosaic.version = 11 : i64} {
  func.func @_fc_kernel(%arg0: memref<2x8x128xf32, #tpu.memory_space<vmem>>, %arg1: memref<8x32xf32, #tpu.memory_space<vmem>>, %arg2: memref<8x1xf32, #tpu.memory_space<vmem>>, %arg3: memref<8x1xf32, #tpu.memory_space<vmem>>, %arg4: memref<1x1xf32, #tpu.memory_space<vmem>>, %arg5: memref<1x2xf32, #tpu.memory_space<vmem>>) attributes {dimension_semantics = [], scalar_prefetch = 0 : i64, scratch_operands = 0 : i64, tpu.core_type = #tpu.core_type<tc>} {
    %c0 = arith.constant 0 : index
    %c0_0 = arith.constant 0 : index
    %c0_1 = arith.constant 0 : index
    %0 = vector.load %arg0[%c0, %c0_0, %c0_1] : memref<2x8x128xf32, #tpu.memory_space<vmem>>, vector<1x8x128xf32>
    %1 = vector.shape_cast %0 : vector<1x8x128xf32> to vector<8x128xf32>
    %c1 = arith.constant 1 : index
    %c0_2 = arith.constant 0 : index
    %c0_3 = arith.constant 0 : index
    %2 = vector.load %arg0[%c1, %c0_2, %c0_3] : memref<2x8x128xf32, #tpu.memory_space<vmem>>, vector<1x8x128xf32>
    %3 = vector.shape_cast %2 : vector<1x8x128xf32> to vector<8x128xf32>
    %4 = arith.addf %1, %3 : vector<8x128xf32>
    %5 = vector.extract_strided_slice %4 {offsets = [0, 0], sizes = [8, 2], strides = [1, 1]} : vector<8x128xf32> to vector<8x2xf32>
    %6 = vector.extract_strided_slice %4 {offsets = [0, 2], sizes = [8, 2], strides = [1, 1]} : vector<8x128xf32> to vector<8x2xf32>
    %7 = vector.extract_strided_slice %4 {offsets = [0, 4], sizes = [8, 2], strides = [1, 1]} : vector<8x128xf32> to vector<8x2xf32>
    %8 = vector.extract_strided_slice %4 {offsets = [0, 6], sizes = [8, 2], strides = [1, 1]} : vector<8x128xf32> to vector<8x2xf32>
    %9 = tpu.concatenate %5, %6, %7, %8 in 0 : vector<8x2xf32>, vector<8x2xf32>, vector<8x2xf32>, vector<8x2xf32> -> vector<32x2xf32>
    %c0_4 = arith.constant 0 : index
    %c0_5 = arith.constant 0 : index
    %10 = vector.load %arg1[%c0_4, %c0_5] : memref<8x32xf32, #tpu.memory_space<vmem>>, vector<8x32xf32>
    %cst = arith.constant dense<0.000000e+00> : vector<8x2xf32>
    %11 = tpu.matmul %10, %9, %cst {dimension_numbers = #tpu.dot_dimension_numbers<[1], [0], [0], [1], [0, 0, 1, 1], [], []>} : vector<8x32xf32>, vector<32x2xf32>, vector<8x2xf32> -> vector<8x2xf32>
    %c0_6 = arith.constant 0 : index
    %c0_7 = arith.constant 0 : index
    %12 = vector.load %arg2[%c0_6, %c0_7] : memref<8x1xf32, #tpu.memory_space<vmem>>, vector<8x1xf32>
    %13 = vector.broadcast %12 : vector<8x1xf32> to vector<8x2xf32>
    %14 = arith.addf %11, %13 : vector<8x2xf32>
    %cst_8 = arith.constant 0.000000e+00 : f32
    %15 = vector.broadcast %cst_8 : f32 to vector<8x2xf32>
    %16 = arith.maximumf %14, %15 : vector<8x2xf32>
    %c0_9 = arith.constant 0 : index
    %c0_10 = arith.constant 0 : index
    %17 = vector.load %arg3[%c0_9, %c0_10] : memref<8x1xf32, #tpu.memory_space<vmem>>, vector<8x1xf32>
    %18 = vector.broadcast %17 : vector<8x1xf32> to vector<8x2xf32>
    %19 = arith.mulf %16, %18 : vector<8x2xf32>
    %cst_11 = arith.constant dense<0.000000e+00> : vector<2xf32>
    %20 = vector.multi_reduction <add>, %19, %cst_11 [0] : vector<8x2xf32> to vector<2xf32>
    %21 = vector.shape_cast %20 : vector<2xf32> to vector<1x2xf32>
    %c0_12 = arith.constant 0 : index
    %c0_13 = arith.constant 0 : index
    %22 = vector.load %arg4[%c0_12, %c0_13] : memref<1x1xf32, #tpu.memory_space<vmem>>, vector<1x1xf32>
    %23 = vector.broadcast %22 : vector<1x1xf32> to vector<1x2xf32>
    %24 = arith.addf %21, %23 : vector<1x2xf32>
    %c0_14 = arith.constant 0 : index
    %c0_15 = arith.constant 0 : index
    %25 = vector.load %arg5[%c0_14, %c0_15] : memref<1x2xf32, #tpu.memory_space<vmem>>, vector<1x2xf32>
    tpu.vector_store %arg5[%c0_14, %c0_15], %24 {strides = array<i32>} : memref<1x2xf32, #tpu.memory_space<vmem>>, vector<1x2xf32>,
    return
  }
}

module attributes {stable_mosaic.version = 11 : i64} {
  func.func @_branch_kernel(%arg0: i32, %arg1: memref<1x8x542xf32, #tpu.memory_space<vmem>>, %arg2: memref<1x8x72xf32, #tpu.memory_space<vmem>>, %arg3: memref<1x8x3xf32, #tpu.memory_space<vmem>>, %arg4: memref<1x8x72xf32, #tpu.memory_space<vmem>>, %arg5: memref<1x8x3xf32, #tpu.memory_space<vmem>>, %arg6: memref<1x8x72xf32, #tpu.memory_space<vmem>>, %arg7: memref<1x8x3xf32, #tpu.memory_space<vmem>>, %arg8: memref<512x146xf32, #tpu.memory_space<vmem>>, %arg9: memref<128x140xf32, #tpu.memory_space<vmem>>, %arg10: memref<128x128xf32, #tpu.memory_space<vmem>>, %arg11: memref<3x512xf32, #tpu.memory_space<vmem>>, %arg12: memref<1x8x128xf32, #tpu.memory_space<vmem>>) attributes {dimension_semantics = [#tpu.dimension_semantics<parallel>], iteration_bounds = array<i64: 2>, scalar_prefetch = 0 : i64, scratch_operands = 0 : i64, tpu.core_type = #tpu.core_type<tc>, window_params = [{transform_indices = @transform_0, window_bounds = array<i64: 1, 8, 542>}, {transform_indices = @transform_1, window_bounds = array<i64: 1, 8, 72>}, {transform_indices = @transform_2, window_bounds = array<i64: 1, 8, 3>}, {transform_indices = @transform_3, window_bounds = array<i64: 1, 8, 72>}, {transform_indices = @transform_4, window_bounds = array<i64: 1, 8, 3>}, {transform_indices = @transform_5, window_bounds = array<i64: 1, 8, 72>}, {transform_indices = @transform_6, window_bounds = array<i64: 1, 8, 3>}, {pipeline_mode = #tpu.pipeline_mode<synchronous>, transform_indices = @transform_7, window_bounds = array<i64: 512, 146>}, {pipeline_mode = #tpu.pipeline_mode<synchronous>, transform_indices = @transform_8, window_bounds = array<i64: 128, 140>}, {pipeline_mode = #tpu.pipeline_mode<synchronous>, transform_indices = @transform_9, window_bounds = array<i64: 128, 128>}, {pipeline_mode = #tpu.pipeline_mode<synchronous>, transform_indices = @transform_10, window_bounds = array<i64: 3, 512>}, {transform_indices = @transform_11, window_bounds = array<i64: 1, 8, 128>}]} {
    %c0 = arith.constant 0 : index
    %c0_0 = arith.constant 0 : index
    %0 = vector.load %arg11[%c0, %c0_0] : memref<3x512xf32, #tpu.memory_space<vmem>>, vector<3x512xf32>
    %c0_1 = arith.constant 0 : index
    %c0_2 = arith.constant 0 : index
    %c0_3 = arith.constant 0 : index
    %1 = vector.load %arg1[%c0_1, %c0_2, %c0_3] : memref<1x8x542xf32, #tpu.memory_space<vmem>>, vector<1x8x542xf32>
    %2 = vector.shape_cast %1 : vector<1x8x542xf32> to vector<8x542xf32>
    %c0_4 = arith.constant 0 : index
    %c0_5 = arith.constant 0 : index
    %c0_6 = arith.constant 0 : index
    %3 = vector.load %arg2[%c0_4, %c0_5, %c0_6] : memref<1x8x72xf32, #tpu.memory_space<vmem>>, vector<1x8x72xf32>
    %4 = vector.shape_cast %3 : vector<1x8x72xf32> to vector<8x72xf32>
    %c0_7 = arith.constant 0 : index
    %c0_8 = arith.constant 0 : index
    %c0_9 = arith.constant 0 : index
    %5 = vector.load %arg3[%c0_7, %c0_8, %c0_9] : memref<1x8x3xf32, #tpu.memory_space<vmem>>, vector<1x8x3xf32>
    %6 = vector.shape_cast %5 : vector<1x8x3xf32> to vector<8x3xf32>
    %7 = vector.extract_strided_slice %0 {offsets = [0, 0], sizes = [1, 512], strides = [1, 1]} : vector<3x512xf32> to vector<1x512xf32>
    %8 = vector.extract_strided_slice %2 {offsets = [0, 0], sizes = [8, 512], strides = [1, 1]} : vector<8x542xf32> to vector<8x512xf32>
    %9 = vector.extract_strided_slice %2 {offsets = [0, 1], sizes = [8, 512], strides = [1, 1]} : vector<8x542xf32> to vector<8x512xf32>
    %10 = vector.extract_strided_slice %2 {offsets = [0, 2], sizes = [8, 512], strides = [1, 1]} : vector<8x542xf32> to vector<8x512xf32>
    %11 = vector.extract_strided_slice %2 {offsets = [0, 14], sizes = [8, 512], strides = [1, 1]} : vector<8x542xf32> to vector<8x512xf32>
    %12 = vector.extract_strided_slice %2 {offsets = [0, 15], sizes = [8, 512], strides = [1, 1]} : vector<8x542xf32> to vector<8x512xf32>
    %13 = vector.extract_strided_slice %2 {offsets = [0, 16], sizes = [8, 512], strides = [1, 1]} : vector<8x542xf32> to vector<8x512xf32>
    %14 = vector.extract_strided_slice %2 {offsets = [0, 28], sizes = [8, 512], strides = [1, 1]} : vector<8x542xf32> to vector<8x512xf32>
    %15 = vector.extract_strided_slice %2 {offsets = [0, 29], sizes = [8, 512], strides = [1, 1]} : vector<8x542xf32> to vector<8x512xf32>
    %16 = vector.extract_strided_slice %2 {offsets = [0, 30], sizes = [8, 512], strides = [1, 1]} : vector<8x542xf32> to vector<8x512xf32>
    %17 = tpu.concatenate %8, %9, %10, %11, %12, %13, %14, %15, %16 in 0 : vector<8x512xf32>, vector<8x512xf32>, vector<8x512xf32>, vector<8x512xf32>, vector<8x512xf32>, vector<8x512xf32>, vector<8x512xf32>, vector<8x512xf32>, vector<8x512xf32> -> vector<72x512xf32>
    %cst = arith.constant dense<0.000000e+00> : vector<8x512xf32>
    %18 = tpu.matmul %4, %17, %cst {dimension_numbers = #tpu.dot_dimension_numbers<[1], [0], [0], [1], [0, 0, 1, 1], [], []>} : vector<8x72xf32>, vector<72x512xf32>, vector<8x512xf32> -> vector<8x512xf32>
    %19 = vector.extract_strided_slice %6 {offsets = [0, 0], sizes = [8, 1], strides = [1, 1]} : vector<8x3xf32> to vector<8x1xf32>
    %20 = vector.broadcast %19 : vector<8x1xf32> to vector<8x512xf32>
    %21 = arith.addf %18, %20 : vector<8x512xf32>
    %22 = vector.broadcast %7 : vector<1x512xf32> to vector<8x512xf32>
    %23 = arith.mulf %21, %22 : vector<8x512xf32>
    %cst_10 = arith.constant dense<0.000000e+00> : vector<8xf32>
    %24 = vector.multi_reduction <add>, %23, %cst_10 [1] : vector<8x512xf32> to vector<8xf32>
    %25 = vector.shape_cast %24 : vector<8xf32> to vector<8x1xf32>
    %cst_11 = arith.constant 0.00347222225 : f32
    %26 = vector.broadcast %cst_11 : f32 to vector<8x1xf32>
    %27 = arith.mulf %25, %26 : vector<8x1xf32>
    %28 = arith.mulf %21, %21 : vector<8x512xf32>
    %29 = vector.broadcast %7 : vector<1x512xf32> to vector<8x512xf32>
    %30 = arith.mulf %28, %29 : vector<8x512xf32>
    %cst_12 = arith.constant dense<0.000000e+00> : vector<8xf32>
    %31 = vector.multi_reduction <add>, %30, %cst_12 [1] : vector<8x512xf32> to vector<8xf32>
    %32 = vector.shape_cast %31 : vector<8xf32> to vector<8x1xf32>
    %cst_13 = arith.constant 0.00347222225 : f32
    %33 = vector.broadcast %cst_13 : f32 to vector<8x1xf32>
    %34 = arith.mulf %32, %33 : vector<8x1xf32>
    %35 = arith.mulf %27, %27 : vector<8x1xf32>
    %36 = arith.subf %34, %35 : vector<8x1xf32>
    %cst_14 = arith.constant 0.000000e+00 : f32
    %37 = vector.broadcast %cst_14 : f32 to vector<8x1xf32>
    %38 = arith.maximumf %36, %37 : vector<8x1xf32>
    %39 = vector.broadcast %27 : vector<8x1xf32> to vector<8x512xf32>
    %40 = arith.subf %21, %39 : vector<8x512xf32>
    %cst_15 = arith.constant 9.99999974E-6 : f32
    %41 = vector.broadcast %cst_15 : f32 to vector<8x1xf32>
    %42 = arith.addf %38, %41 : vector<8x1xf32>
    %43 = math.rsqrt %42 : vector<8x1xf32>
    %44 = vector.broadcast %43 : vector<8x1xf32> to vector<8x512xf32>
    %45 = arith.mulf %40, %44 : vector<8x512xf32>
    %46 = vector.extract_strided_slice %6 {offsets = [0, 1], sizes = [8, 1], strides = [1, 1]} : vector<8x3xf32> to vector<8x1xf32>
    %47 = vector.broadcast %46 : vector<8x1xf32> to vector<8x512xf32>
    %48 = arith.mulf %45, %47 : vector<8x512xf32>
    %49 = vector.extract_strided_slice %6 {offsets = [0, 2], sizes = [8, 1], strides = [1, 1]} : vector<8x3xf32> to vector<8x1xf32>
    %50 = vector.broadcast %49 : vector<8x1xf32> to vector<8x512xf32>
    %51 = arith.addf %48, %50 : vector<8x512xf32>
    %cst_16 = arith.constant 0.000000e+00 : f32
    %52 = vector.broadcast %cst_16 : f32 to vector<8x512xf32>
    %53 = arith.maximumf %51, %52 : vector<8x512xf32>
    %c0_17 = arith.constant 0 : index
    %c0_18 = arith.constant 0 : index
    %54 = vector.load %arg8[%c0_17, %c0_18] : memref<512x146xf32, #tpu.memory_space<vmem>>, vector<512x146xf32>
    %cst_19 = arith.constant dense<0.000000e+00> : vector<8x146xf32>
    %55 = tpu.matmul %53, %54, %cst_19 {dimension_numbers = #tpu.dot_dimension_numbers<[1], [0], [0], [1], [0, 0, 1, 1], [], []>} : vector<8x512xf32>, vector<512x146xf32>, vector<8x146xf32> -> vector<8x146xf32>
    %c0_20 = arith.constant 0 : index
    %c0_21 = arith.constant 0 : index
    %c0_22 = arith.constant 0 : index
    %56 = vector.load %arg4[%c0_20, %c0_21, %c0_22] : memref<1x8x72xf32, #tpu.memory_space<vmem>>, vector<1x8x72xf32>
    %57 = vector.shape_cast %56 : vector<1x8x72xf32> to vector<8x72xf32>
    %c0_23 = arith.constant 0 : index
    %c0_24 = arith.constant 0 : index
    %c0_25 = arith.constant 0 : index
    %58 = vector.load %arg5[%c0_23, %c0_24, %c0_25] : memref<1x8x3xf32, #tpu.memory_space<vmem>>, vector<1x8x3xf32>
    %59 = vector.shape_cast %58 : vector<1x8x3xf32> to vector<8x3xf32>
    %60 = vector.extract_strided_slice %0 {offsets = [1, 0], sizes = [1, 128], strides = [1, 1]} : vector<3x512xf32> to vector<1x128xf32>
    %61 = vector.extract_strided_slice %55 {offsets = [0, 0], sizes = [8, 128], strides = [1, 1]} : vector<8x146xf32> to vector<8x128xf32>
    %62 = vector.extract_strided_slice %55 {offsets = [0, 1], sizes = [8, 128], strides = [1, 1]} : vector<8x146xf32> to vector<8x128xf32>
    %63 = vector.extract_strided_slice %55 {offsets = [0, 2], sizes = [8, 128], strides = [1, 1]} : vector<8x146xf32> to vector<8x128xf32>
    %64 = vector.extract_strided_slice %55 {offsets = [0, 8], sizes = [8, 128], strides = [1, 1]} : vector<8x146xf32> to vector<8x128xf32>
    %65 = vector.extract_strided_slice %55 {offsets = [0, 9], sizes = [8, 128], strides = [1, 1]} : vector<8x146xf32> to vector<8x128xf32>
    %66 = vector.extract_strided_slice %55 {offsets = [0, 10], sizes = [8, 128], strides = [1, 1]} : vector<8x146xf32> to vector<8x128xf32>
    %67 = vector.extract_strided_slice %55 {offsets = [0, 16], sizes = [8, 128], strides = [1, 1]} : vector<8x146xf32> to vector<8x128xf32>
    %68 = vector.extract_strided_slice %55 {offsets = [0, 17], sizes = [8, 128], strides = [1, 1]} : vector<8x146xf32> to vector<8x128xf32>
    %69 = vector.extract_strided_slice %55 {offsets = [0, 18], sizes = [8, 128], strides = [1, 1]} : vector<8x146xf32> to vector<8x128xf32>
    %70 = tpu.concatenate %61, %62, %63, %64, %65, %66, %67, %68, %69 in 0 : vector<8x128xf32>, vector<8x128xf32>, vector<8x128xf32>, vector<8x128xf32>, vector<8x128xf32>, vector<8x128xf32>, vector<8x128xf32>, vector<8x128xf32>, vector<8x128xf32> -> vector<72x128xf32>
    %cst_26 = arith.constant dense<0.000000e+00> : vector<8x128xf32>
    %71 = tpu.matmul %57, %70, %cst_26 {dimension_numbers = #tpu.dot_dimension_numbers<[1], [0], [0], [1], [0, 0, 1, 1], [], []>} : vector<8x72xf32>, vector<72x128xf32>, vector<8x128xf32> -> vector<8x128xf32>
    %72 = vector.extract_strided_slice %59 {offsets = [0, 0], sizes = [8, 1], strides = [1, 1]} : vector<8x3xf32> to vector<8x1xf32>
    %73 = vector.broadcast %72 : vector<8x1xf32> to vector<8x128xf32>
    %74 = arith.addf %71, %73 : vector<8x128xf32>
    %75 = vector.broadcast %60 : vector<1x128xf32> to vector<8x128xf32>
    %76 = arith.mulf %74, %75 : vector<8x128xf32>
    %cst_27 = arith.constant dense<0.000000e+00> : vector<8xf32>
    %77 = vector.multi_reduction <add>, %76, %cst_27 [1] : vector<8x128xf32> to vector<8xf32>
    %78 = vector.shape_cast %77 : vector<8xf32> to vector<8x1xf32>
    %cst_28 = arith.constant 0.013888889 : f32
    %79 = vector.broadcast %cst_28 : f32 to vector<8x1xf32>
    %80 = arith.mulf %78, %79 : vector<8x1xf32>
    %81 = arith.mulf %74, %74 : vector<8x128xf32>
    %82 = vector.broadcast %60 : vector<1x128xf32> to vector<8x128xf32>
    %83 = arith.mulf %81, %82 : vector<8x128xf32>
    %cst_29 = arith.constant dense<0.000000e+00> : vector<8xf32>
    %84 = vector.multi_reduction <add>, %83, %cst_29 [1] : vector<8x128xf32> to vector<8xf32>
    %85 = vector.shape_cast %84 : vector<8xf32> to vector<8x1xf32>
    %cst_30 = arith.constant 0.013888889 : f32
    %86 = vector.broadcast %cst_30 : f32 to vector<8x1xf32>
    %87 = arith.mulf %85, %86 : vector<8x1xf32>
    %88 = arith.mulf %80, %80 : vector<8x1xf32>
    %89 = arith.subf %87, %88 : vector<8x1xf32>
    %cst_31 = arith.constant 0.000000e+00 : f32
    %90 = vector.broadcast %cst_31 : f32 to vector<8x1xf32>
    %91 = arith.maximumf %89, %90 : vector<8x1xf32>
    %92 = vector.broadcast %80 : vector<8x1xf32> to vector<8x128xf32>
    %93 = arith.subf %74, %92 : vector<8x128xf32>
    %cst_32 = arith.constant 9.99999974E-6 : f32
    %94 = vector.broadcast %cst_32 : f32 to vector<8x1xf32>
    %95 = arith.addf %91, %94 : vector<8x1xf32>
    %96 = math.rsqrt %95 : vector<8x1xf32>
    %97 = vector.broadcast %96 : vector<8x1xf32> to vector<8x128xf32>
    %98 = arith.mulf %93, %97 : vector<8x128xf32>
    %99 = vector.extract_strided_slice %59 {offsets = [0, 1], sizes = [8, 1], strides = [1, 1]} : vector<8x3xf32> to vector<8x1xf32>
    %100 = vector.broadcast %99 : vector<8x1xf32> to vector<8x128xf32>
    %101 = arith.mulf %98, %100 : vector<8x128xf32>
    %102 = vector.extract_strided_slice %59 {offsets = [0, 2], sizes = [8, 1], strides = [1, 1]} : vector<8x3xf32> to vector<8x1xf32>
    %103 = vector.broadcast %102 : vector<8x1xf32> to vector<8x128xf32>
    %104 = arith.addf %101, %103 : vector<8x128xf32>
    %cst_33 = arith.constant 0.000000e+00 : f32
    %105 = vector.broadcast %cst_33 : f32 to vector<8x128xf32>
    %106 = arith.maximumf %104, %105 : vector<8x128xf32>
    %c0_34 = arith.constant 0 : index
    %c0_35 = arith.constant 0 : index
    %107 = vector.load %arg9[%c0_34, %c0_35] : memref<128x140xf32, #tpu.memory_space<vmem>>, vector<128x140xf32>
    %cst_36 = arith.constant dense<0.000000e+00> : vector<8x140xf32>
    %108 = tpu.matmul %106, %107, %cst_36 {dimension_numbers = #tpu.dot_dimension_numbers<[1], [0], [0], [1], [0, 0, 1, 1], [], []>} : vector<8x128xf32>, vector<128x140xf32>, vector<8x140xf32> -> vector<8x140xf32>
    %c0_37 = arith.constant 0 : index
    %c0_38 = arith.constant 0 : index
    %c0_39 = arith.constant 0 : index
    %109 = vector.load %arg6[%c0_37, %c0_38, %c0_39] : memref<1x8x72xf32, #tpu.memory_space<vmem>>, vector<1x8x72xf32>
    %110 = vector.shape_cast %109 : vector<1x8x72xf32> to vector<8x72xf32>
    %c0_40 = arith.constant 0 : index
    %c0_41 = arith.constant 0 : index
    %c0_42 = arith.constant 0 : index
    %111 = vector.load %arg7[%c0_40, %c0_41, %c0_42] : memref<1x8x3xf32, #tpu.memory_space<vmem>>, vector<1x8x3xf32>
    %112 = vector.shape_cast %111 : vector<1x8x3xf32> to vector<8x3xf32>
    %113 = vector.extract_strided_slice %0 {offsets = [2, 0], sizes = [1, 128], strides = [1, 1]} : vector<3x512xf32> to vector<1x128xf32>
    %114 = vector.extract_strided_slice %108 {offsets = [0, 0], sizes = [8, 128], strides = [1, 1]} : vector<8x140xf32> to vector<8x128xf32>
    %115 = vector.extract_strided_slice %108 {offsets = [0, 1], sizes = [8, 128], strides = [1, 1]} : vector<8x140xf32> to vector<8x128xf32>
    %116 = vector.extract_strided_slice %108 {offsets = [0, 2], sizes = [8, 128], strides = [1, 1]} : vector<8x140xf32> to vector<8x128xf32>
    %117 = vector.extract_strided_slice %108 {offsets = [0, 5], sizes = [8, 128], strides = [1, 1]} : vector<8x140xf32> to vector<8x128xf32>
    %118 = vector.extract_strided_slice %108 {offsets = [0, 6], sizes = [8, 128], strides = [1, 1]} : vector<8x140xf32> to vector<8x128xf32>
    %119 = vector.extract_strided_slice %108 {offsets = [0, 7], sizes = [8, 128], strides = [1, 1]} : vector<8x140xf32> to vector<8x128xf32>
    %120 = vector.extract_strided_slice %108 {offsets = [0, 10], sizes = [8, 128], strides = [1, 1]} : vector<8x140xf32> to vector<8x128xf32>
    %121 = vector.extract_strided_slice %108 {offsets = [0, 11], sizes = [8, 128], strides = [1, 1]} : vector<8x140xf32> to vector<8x128xf32>
    %122 = vector.extract_strided_slice %108 {offsets = [0, 12], sizes = [8, 128], strides = [1, 1]} : vector<8x140xf32> to vector<8x128xf32>
    %123 = tpu.concatenate %114, %115, %116, %117, %118, %119, %120, %121, %122 in 0 : vector<8x128xf32>, vector<8x128xf32>, vector<8x128xf32>, vector<8x128xf32>, vector<8x128xf32>, vector<8x128xf32>, vector<8x128xf32>, vector<8x128xf32>, vector<8x128xf32> -> vector<72x128xf32>
    %cst_43 = arith.constant dense<0.000000e+00> : vector<8x128xf32>
    %124 = tpu.matmul %110, %123, %cst_43 {dimension_numbers = #tpu.dot_dimension_numbers<[1], [0], [0], [1], [0, 0, 1, 1], [], []>} : vector<8x72xf32>, vector<72x128xf32>, vector<8x128xf32> -> vector<8x128xf32>
    %125 = vector.extract_strided_slice %112 {offsets = [0, 0], sizes = [8, 1], strides = [1, 1]} : vector<8x3xf32> to vector<8x1xf32>
    %126 = vector.broadcast %125 : vector<8x1xf32> to vector<8x128xf32>
    %127 = arith.addf %124, %126 : vector<8x128xf32>
    %128 = vector.broadcast %113 : vector<1x128xf32> to vector<8x128xf32>
    %129 = arith.mulf %127, %128 : vector<8x128xf32>
    %cst_44 = arith.constant dense<0.000000e+00> : vector<8xf32>
    %130 = vector.multi_reduction <add>, %129, %cst_44 [1] : vector<8x128xf32> to vector<8xf32>
    %131 = vector.shape_cast %130 : vector<8xf32> to vector<8x1xf32>
    %cst_45 = arith.constant 0.055555556 : f32
    %132 = vector.broadcast %cst_45 : f32 to vector<8x1xf32>
    %133 = arith.mulf %131, %132 : vector<8x1xf32>
    %134 = arith.mulf %127, %127 : vector<8x128xf32>
    %135 = vector.broadcast %113 : vector<1x128xf32> to vector<8x128xf32>
    %136 = arith.mulf %134, %135 : vector<8x128xf32>
    %cst_46 = arith.constant dense<0.000000e+00> : vector<8xf32>
    %137 = vector.multi_reduction <add>, %136, %cst_46 [1] : vector<8x128xf32> to vector<8xf32>
    %138 = vector.shape_cast %137 : vector<8xf32> to vector<8x1xf32>
    %cst_47 = arith.constant 0.055555556 : f32
    %139 = vector.broadcast %cst_47 : f32 to vector<8x1xf32>
    %140 = arith.mulf %138, %139 : vector<8x1xf32>
    %141 = arith.mulf %133, %133 : vector<8x1xf32>
    %142 = arith.subf %140, %141 : vector<8x1xf32>
    %cst_48 = arith.constant 0.000000e+00 : f32
    %143 = vector.broadcast %cst_48 : f32 to vector<8x1xf32>
    %144 = arith.maximumf %142, %143 : vector<8x1xf32>
    %145 = vector.broadcast %133 : vector<8x1xf32> to vector<8x128xf32>
    %146 = arith.subf %127, %145 : vector<8x128xf32>
    %cst_49 = arith.constant 9.99999974E-6 : f32
    %147 = vector.broadcast %cst_49 : f32 to vector<8x1xf32>
    %148 = arith.addf %144, %147 : vector<8x1xf32>
    %149 = math.rsqrt %148 : vector<8x1xf32>
    %150 = vector.broadcast %149 : vector<8x1xf32> to vector<8x128xf32>
    %151 = arith.mulf %146, %150 : vector<8x128xf32>
    %152 = vector.extract_strided_slice %112 {offsets = [0, 1], sizes = [8, 1], strides = [1, 1]} : vector<8x3xf32> to vector<8x1xf32>
    %153 = vector.broadcast %152 : vector<8x1xf32> to vector<8x128xf32>
    %154 = arith.mulf %151, %153 : vector<8x128xf32>
    %155 = vector.extract_strided_slice %112 {offsets = [0, 2], sizes = [8, 1], strides = [1, 1]} : vector<8x3xf32> to vector<8x1xf32>
    %156 = vector.broadcast %155 : vector<8x1xf32> to vector<8x128xf32>
    %157 = arith.addf %154, %156 : vector<8x128xf32>
    %c0_50 = arith.constant 0 : index
    %c0_51 = arith.constant 0 : index
    %158 = vector.load %arg10[%c0_50, %c0_51] : memref<128x128xf32, #tpu.memory_space<vmem>>, vector<128x128xf32>
    %cst_52 = arith.constant dense<0.000000e+00> : vector<8x128xf32>
    %159 = tpu.matmul %157, %158, %cst_52 {dimension_numbers = #tpu.dot_dimension_numbers<[1], [0], [0], [1], [0, 0, 1, 1], [], []>} : vector<8x128xf32>, vector<128x128xf32>, vector<8x128xf32> -> vector<8x128xf32>
    %c0_53 = arith.constant 0 : index
    %c0_54 = arith.constant 0 : index
    %c0_55 = arith.constant 0 : index
    %160 = vector.load %arg12[%c0_53, %c0_54, %c0_55] : memref<1x8x128xf32, #tpu.memory_space<vmem>>, vector<1x8x128xf32>
    %161 = vector.shape_cast %160 : vector<1x8x128xf32> to vector<8x128xf32>
    %162 = vector.shape_cast %159 : vector<8x128xf32> to vector<1x8x128xf32>
    tpu.vector_store %arg12[%c0_53, %c0_54, %c0_55], %162 {strides = array<i32>} : memref<1x8x128xf32, #tpu.memory_space<vmem>>, vector<1x8x128xf32>,
    return
  }
  func.func @transform_0(%arg0: i32) -> (i32, i32, i32) {
    %c0_i32 = arith.constant 0 : i32
    %c0_i32_0 = arith.constant 0 : i32
    %c0_i32_1 = arith.constant 0 : i32
    return %arg0, %c0_i32, %c0_i32_0 : i32, i32, i32
  }
  func.func @transform_1(%arg0: i32) -> (i32, i32, i32) {
    %c0_i32 = arith.constant 0 : i32
    %c0_i32_0 = arith.constant 0 : i32
    %c0_i32_1 = arith.constant 0 : i32
    return %arg0, %c0_i32, %c0_i32_0 : i32, i32, i32
  }
  func.func @transform_2(%arg0: i32) -> (i32, i32, i32) {
    %c0_i32 = arith.constant 0 : i32
    %c0_i32_0 = arith.constant 0 : i32
    %c0_i32_1 = arith.constant 0 : i32
    return %arg0, %c0_i32, %c0_i32_0 : i32, i32, i32
  }
  func.func @transform_3(%arg0: i32) -> (i32, i32, i32) {
    %c0_i32 = arith.constant 0 : i32
    %c0_i32_0 = arith.constant 0 : i32
    %c0_i32_1 = arith.constant 0 : i32
    return %arg0, %c0_i32, %c0_i32_0 : i32, i32, i32
  }
  func.func @transform_4(%arg0: i32) -> (i32, i32, i32) {
    %c0_i32 = arith.constant 0 : i32
    %c0_i32_0 = arith.constant 0 : i32
    %c0_i32_1 = arith.constant 0 : i32
    return %arg0, %c0_i32, %c0_i32_0 : i32, i32, i32
  }
  func.func @transform_5(%arg0: i32) -> (i32, i32, i32) {
    %c0_i32 = arith.constant 0 : i32
    %c0_i32_0 = arith.constant 0 : i32
    %c0_i32_1 = arith.constant 0 : i32
    return %arg0, %c0_i32, %c0_i32_0 : i32, i32, i32
  }
  func.func @transform_6(%arg0: i32) -> (i32, i32, i32) {
    %c0_i32 = arith.constant 0 : i32
    %c0_i32_0 = arith.constant 0 : i32
    %c0_i32_1 = arith.constant 0 : i32
    return %arg0, %c0_i32, %c0_i32_0 : i32, i32, i32
  }
  func.func @transform_7(%arg0: i32) -> (i32, i32) {
    %c0_i32 = arith.constant 0 : i32
    %c0_i32_0 = arith.constant 0 : i32
    %c0_i32_1 = arith.constant 0 : i32
    return %c0_i32, %c0_i32_0 : i32, i32
  }
  func.func @transform_8(%arg0: i32) -> (i32, i32) {
    %c0_i32 = arith.constant 0 : i32
    %c0_i32_0 = arith.constant 0 : i32
    %c0_i32_1 = arith.constant 0 : i32
    return %c0_i32, %c0_i32_0 : i32, i32
  }
  func.func @transform_9(%arg0: i32) -> (i32, i32) {
    %c0_i32 = arith.constant 0 : i32
    %c0_i32_0 = arith.constant 0 : i32
    %c0_i32_1 = arith.constant 0 : i32
    return %c0_i32, %c0_i32_0 : i32, i32
  }
  func.func @transform_10(%arg0: i32) -> (i32, i32) {
    %c0_i32 = arith.constant 0 : i32
    %c0_i32_0 = arith.constant 0 : i32
    %c0_i32_1 = arith.constant 0 : i32
    return %c0_i32, %c0_i32_0 : i32, i32
  }
  func.func @transform_11(%arg0: i32) -> (i32, i32, i32) {
    %c0_i32 = arith.constant 0 : i32
    %c0_i32_0 = arith.constant 0 : i32
    %c0_i32_1 = arith.constant 0 : i32
    return %arg0, %c0_i32, %c0_i32_0 : i32, i32, i32
  }
}

</mosaic_0001>

<bundles_post_ra>
// kernel: mine_forward.3
= control target key start
LH: loop header
LB: loop body
LE: loop exit
PB: predicated region body
PF: predicated region fallthrough
CT: control target
= control target key end

     0   :  { %s287_s0 = inlined_call_operand.vmem [shape: f32[2,8,128], index: 0, kind: input, shape index: {}]   ;;  %s288_s1 = inlined_call_operand.vmem [shape: f32[8,32], index: 1, kind: input, shape index: {}]   ;;  %s289_s2 = inlined_call_operand.vmem [shape: f32[8,1], index: 2, kind: input, shape index: {}]   ;;  %s290_s3 = inlined_call_operand.vmem [shape: f32[8,1], index: 3, kind: input, shape index: {}]   ;;  %s291_s4 = inlined_call_operand.<no memory space> [shape: f32[1,1], index: 4, kind: input, shape index: {}]   ;;  %s292_s5 = inlined_call_operand.hbm [shape: f32[1,2], index: 5, kind: output, shape index: {}]  }
   0x1   :  { %v10_v0 = vstv %s291_s4 }
   0x2   :  { %11 = vst [vmem:[#allocation2] sm:$0x1] %v10_v0 }
   0x3   :  { %v23_v1 = vld [vmem:[%s287_s0] sm:$0xff]  ;;  %v161_v2 = vld [vmem:[%s287_s0 + $0x8] sm:$0xff]  ;;  %v219_v4 = vmov 0.0|0.0   ;;  %vm220_vm0 = vmmov 0   ;;  %v221_v5 = vmov 0.0   ;;  %v222_v6 = vmov 0  }
   0x4   :  { %v26_v3 = vadd.f32 %v161_v2, %v23_v1  ;;  %179 = vmatprep.subr.bf16.mxu0 %v219_v4  ;;  %176 = vmatprep.mubr.msk.f32.mxu0 %vm220_vm0, %v221_v5 }
   0x5   :  { %193 = vset.pattern.permute.xlu1 %v222_v6 }
   0x6   :  { %12 = vsyncpa [#allocation4], 0  ;;  %s223_s24 = smov 126   ;;  %s224_s4 = smov 122   ;;  %v38_v7 = vld [vmem:[%s289_s2] sm:$0xff]  ;;  %194 = vset.pattern.permute.xlu0 %v222_v6  ;;  %vm44_vm1 = vcmask 261120   ;;  %v140_v23 = vlaneseq }
   0x7   :  { %28 = vrot.lane.b32.xlu0 %v26_v3, %s223_s24  ;;  %34 = vrot.lane.b32.xlu1 %v26_v3, %s224_s4  ;;  %s225_s27 = smov 124   ;;  %v119_v9 = vld [vmem:[%s290_s3] sm:$0xff]  ;;  %vm126_vm2 = vcmask 15360   ;;  %vm145_vm3 = vcmask 8192  }
   0x8   :  { %v37_v15 = vld [vmem:[%s288_s1] sm:$0xff]  ;;  %v141_v26 = vshrl.u32 %v140_v23, 7  ;;  %s226_s1 = smov [#allocation3]  }
   0x9   :  { %v134_v8 = vld [vmem:[#allocation2] sm:$0x1]  ;;  %s153_s3 = sshll.u32 %s226_s1, 4  ;;  %s154_s3 = int_to_ptr.vmem [resolvable:$true] %s153_s3 }
   0xa   :  { %v142_v29 = vsub.s32 0, %v141_v26  ;;  %s195_s30 = scalar_lea.vmem %s154_s3, 16  ;;  %s199_s6 = scalar_lea.vmem %s154_s3, 32 }
   0xb   :  { %31 = vrot.lane.b32.xlu0 %v26_v3, %s225_s27  ;;  %41 = vperm.xlu1 %193, %v38_v7   ;;  %p196_p0 = scmp.ne.s32.totalorder %s154_s3, %s195_s30  ;;  %p200_p1 = scmp.lt.s32.totalorder %s154_s3, %s154_s3 }
   0xc   :  { %p201_p2 = scmp.lt.s32.totalorder %s199_s6, %s195_s30 }
   0xe   :  { %p202_p3 = por %p201_p2, %p200_p1 }
   0xf   :  { %137 = vperm.xlu1 %193, %v134_v8   ;;  %122 = vperm.xlu0 %194, %v119_v9  }
  0x10   :  { %p203_p4 = pnand %p202_p3, %p196_p0 }
  0x79   :  { %v29_v10 = vpop.permute.xlu0 %28  ;;  %v35_v12 = vpop.permute.xlu1 %34 }
  0x7a   :  { %v180_v11 = vpack.c.bf16 %v29_v10, %v26_v3 }
  0x7c   :  { %181 = vmatpush3.bf16.msra.mxu0 %v180_v11 }
  0x7d   :  { %v32_v13 = vpop.permute.xlu0 %31  ;;  %182 = vmatprep.subr.bf16.mxu0 %v219_v4 }
  0x7e   :  { %v183_v14 = vpack.c.bf16 %v35_v12, %v32_v13 }
  0x80   :  { %184 = vmatpush3.bf16.msra.mxu0 %v183_v14 }
  0x83   :  { %177 = vmatmul.mubr.msk.f32.vlgmr.msra.gmra.mrb[0].mxu0 %vm44_vm1, %v37_v15 }
  0x8a   :  { %v42_v16 = vpop.permute.xlu1 %41 }
  0x8e   :  { %v123_v20 = vpop.permute.xlu0 %122  ;;  %v138_v31 = vpop.permute.xlu1 %137 }
  0x8f   :  { %v143_v33 = vrot.slane %v138_v31, %v142_v29 }
 0x156   :  { %v114_v17 = vpop.f32.mrb[0].mxu0 }
 0x157   :  { %v115_v18 = vadd.f32 %v114_v17, %v42_v16  ;;  %v178_v19 = vpop.f32.mrb[1].mxu0 }
 0x159   :  { %v118_v21 = vmax.f32 %v115_v18, 0.0 }
 0x15b   :  { %v125_v22 = vmul.f32 %v123_v20, %v118_v21 }
 0x15d   :  { %v127_v24 = vsel %vm126_vm2, %v125_v22, 0.0 }
 0x15e   :  { %v128_v25 = vrot.slane %v127_v24, 4 }
 0x160   :  { %v129_v27 = vadd.f32 %v128_v25, %v127_v24 }
 0x162   :  { %v130_v28 = vrot.slane %v129_v27, 2 }
 0x164   :  { %v131_v30 = vadd.f32 %v130_v28, %v129_v27 }
 0x166   :  { %v132_v32 = vrot.slane %v131_v30, 1 }
 0x168   :  { %v133_v34 = vadd.f32 %v132_v32, %v131_v30 }
 0x16a   :  { %v144_v35 = vadd.f32 %v143_v33, %v133_v34 }
 0x16c   :  { %146 = vst.msk [vmem:[#allocation3] sm:$0x1] %vm145_vm3, %v144_v35 }
 0x16d   :  { %206 = shalt.err (!%p203_p4)
}
 0x16e   :  { %s207_s9 = scalar_lea.hbm %s292_s5, 16 }
 0x16f   :  { %p208_p5 = scmp.ne.s32.totalorder %s292_s5, %s207_s9  ;;  %p211_p6 = scmp.lt.u32.totalorder %s207_s9, %s292_s5 }
 0x171   :  { %p213_p7 = pnand %p211_p6, %p208_p5 }
 0x173   :  { %216 = shalt.err (!%p213_p7)
}
 0x174   :  { %156 = dma.vmem_to_hbm [thread:$0]  %s154_s3, 16, %s292_s5, [#allocation4]  }
 0x175   :  { %217 = dma.done.wait [#allocation4], 16  }
 0x176   :  { %218 = vsyncadd [#allocation4], 4294967280 }
 0x177   :  { %160 = vsyncpa [#allocation4], 1 }

// kernel: mine_forward.2
= control target key start
LH: loop header
LB: loop body
LE: loop exit
PB: predicated region body
PF: predicated region fallthrough
CT: control target
= control target key end

     0   :  { %s2471_s17 = smov 0   ;;  %s3316_s0 = inlined_call_operand.vmem [shape: f32[2,8,542], index: 0, kind: input, shape index: {}]   ;;  %s3317_s1 = inlined_call_operand.vmem [shape: f32[2,8,72], index: 1, kind: input, shape index: {}]   ;;  %s3318_s2 = inlined_call_operand.vmem [shape: f32[2,8,3], index: 2, kind: input, shape index: {}]   ;;  %s3319_s3 = inlined_call_operand.vmem [shape: f32[2,8,72], index: 3, kind: input, shape index: {}]   ;;  %s3320_s4 = inlined_call_operand.vmem [shape: f32[2,8,3], index: 4, kind: input, shape index: {}]   ;;  %s3321_s5 = inlined_call_operand.vmem [shape: f32[2,8,72], index: 5, kind: input, shape index: {}]   ;;  %s3322_s6 = inlined_call_operand.vmem [shape: f32[2,8,3], index: 6, kind: input, shape index: {}]   ;;  %s3323_s7 = inlined_call_operand.vmem [shape: f32[512,146], index: 7, kind: input, shape index: {}]   ;;  %s3324_s8 = inlined_call_operand.vmem [shape: f32[128,140], index: 8, kind: input, shape index: {}]   ;;  %s3325_s9 = inlined_call_operand.vmem [shape: f32[128,128], index: 9, kind: input, shape index: {}]   ;;  %s3326_s10 = inlined_call_operand.vmem [shape: f32[3,512], index: 10, kind: input, shape index: {}]   ;;  %s3327_s11 = inlined_call_operand.vmem [shape: f32[2,8,128], index: 11, kind: output, shape index: {}]  }
   0x1 LB: > { %s1815_s18 = sadd.s32 4294967295, %s2385_s17   ;;  %p1819_p0 = scmp.ge.s32.totalorder %s2385_s17, 1  ;;  %s2385_s17 = sphi %s2471_s17, %s21_s17  }
   0x2   : > { %p391_p1 = scmp.lt.s32.totalorder %s2385_s17, 3 }
   0x4   : > { %p392_p2 = pnand %p1819_p0, %p391_p1 }
   0x5   : > { %p454_p3 = scmp.lt.s32.totalorder (!%p392_p2), %s1815_s18, 1  ;;  %s2387_s23 = smov (!%p392_p2), 126   ;;  %v2394_v6 = vmov (!%p392_p2), 0.0   ;;  %v2396_v9 = vmov (!%p392_p2), 0   ;;  %vm511_vm0 = vcmask (!%p392_p2), 1039360   ;;  %vm549_vm1 = vcmask (!%p392_p2), 932864  }
   0x6   : > { %395 = sbr.rel (%p392_p2) target bundleno = 2355 (0x933), region = 64  ;;  %s2388_s24 = smov (!%p392_p2), 127   ;;  %726 = vmatprep.mubr.f32.mxu1 (!%p392_p2), %v2394_v6  ;;  %2293 = vset.pattern.permute.xlu0 (!%p392_p2), %v2396_v9  ;;  %vm530_vm2 = vcmask (!%p392_p2), 1031168   ;;  %vm587_vm3 = vcmask (!%p392_p2), 916480   ;;  %vm568_vm4 = vcmask (!%p392_p2), 924672   ;;  %vm625_vm5 = vcmask (!%p392_p2), 809984  }
   0x7   : > { %s2389_s25 = smov (!%p392_p2), 114   ;;  %s2390_s26 = smov (!%p392_p2), 112   ;;  %vm606_vm6 = vcmask (!%p392_p2), 818176   ;;  %vm644_vm7 = vcmask (!%p392_p2), 801792   ;;  %vm658_vm8 = vcmask (!%p392_p2), 588800   ;;  %vm2404_vm9 = vmmov (!%p392_p2), 0  }
   0x8   : > { %s2391_s27 = smov (!%p392_p2), 113   ;;  %s2392_s28 = smov (!%p392_p2), 99   ;;  %vm1189_vm10 = vcmask (!%p392_p2), 982016   ;;  %vm1196_vm11 = vcmask (!%p392_p2), 973824   ;;  %vm1203_vm12 = vcmask (!%p392_p2), 965632   ;;  %vm1216_vm13 = vcmask (!%p392_p2), 908288  }
   0x9   : > { %s2393_s29 = smov (!%p392_p2), 100   ;;  %s2395_s30 = smov (!%p392_p2), 98   ;;  %vm1223_vm14 = vcmask (!%p392_p2), 900096   ;;  %vm1458_vm15 = vcmask (!%p392_p2), 1006592  }
   0xa   : > { %s2400_s13 = smov (!%p392_p2), 110   ;;  %s2401_s14 = smov (!%p392_p2), 120  }
   0xb   : > { %s2403_s16 = smov (!%p392_p2), 118   ;;  %s2407_s20 = smov (!%p392_p2), 123  }
   0xd   : > { %s3329_s18 = smov (!%p454_p3, %s1815_s18), 1 }
   0xe   : > { %s2190_s19 = smul.u32 40, %s3329_s18  ;;  %s2526_s12 = sshll.u32 %s3329_s18, 3 }
   0xf   : > { %s466_s15 = scalar_lea.vmem %s3318_s2, %s2526_s12  ;;  %s2405_s18 = smov 111  }
  0x10   : > { %s2485_s22 = scalar_lea.vmem %s3316_s0, %s2190_s19  ;;  %v2533_v10 = vld [vmem:[%s466_s15] sm:$0xff]  ;;  %s462_s19 = scalar_lea.vmem %s3317_s1, %s2526_s12 }
  0x11   : > { %v2488_v0 = vld [vmem:[%s2485_s22 + $0x8] sm:$0xff]  ;;  %v2491_v1 = vld [vmem:[%s2485_s22 + $0x10] sm:$0xff]  ;;  %v2494_v2 = vld [vmem:[%s2485_s22] sm:$0xff]  ;;  %s2402_s15 = smov 119   ;;  %s474_s21 = scalar_lea.vmem %s3320_s4, %s2526_s12 }
  0x12   : > { %v2233_v3 = vpack.i.bf16 %v2491_v1, %v2488_v0  ;;  %v2499_v4 = vld [vmem:[%s2485_s22 + $0x18] sm:$0xff]  ;;  %v493_v7 = vld [vmem:[%s2485_s22 + $0x20] sm:$0xff] }
  0x13   : > { %v2228_v5 = vpack.i.bf16 %v2499_v4, %v2494_v2  ;;  %v2268_v8 = vpack.i.bf16 %v493_v7, %v2499_v4 }
  0x14   : > { %2234 = vrot.lane.b32.xlu1 %v2233_v3, %s2387_s23  ;;  %2224 = vrot.lane.b32.xlu0 %v2233_v3, %s2388_s24 }
  0x18   : > { %2239 = vrot.lane.b32.xlu1 %v2233_v3, %s2389_s25  ;;  %2229 = vrot.lane.b32.xlu0 %v2228_v5, %s2388_s24 }
  0x1c   : > { %539 = vrot.lane.b32.xlu1 %v2494_v2, %s2389_s25  ;;  %520 = vrot.lane.b32.xlu0 %v2494_v2, %s2387_s23 }
  0x20   : > { %2249 = vrot.lane.b32.xlu1 %v2233_v3, %s2390_s26  ;;  %2244 = vrot.lane.b32.xlu0 %v2233_v3, %s2391_s27 }
  0x24   : > { %577 = vrot.lane.b32.xlu1 %v2494_v2, %s2390_s26  ;;  %558 = vrot.lane.b32.xlu0 %v2494_v2, %s2391_s27 }
  0x28   : > { %2259 = vrot.lane.b32.xlu1 %v2233_v3, %s2392_s28  ;;  %2254 = vrot.lane.b32.xlu0 %v2233_v3, %s2393_s29 }
  0x2c   : > { %615 = vrot.lane.b32.xlu1 %v2494_v2, %s2392_s28  ;;  %596 = vrot.lane.b32.xlu0 %v2494_v2, %s2393_s29 }
  0x30   : > { %636 = vrot.lane.b32.xlu1 %v2488_v0, %s2395_s30  ;;  %509 = vrot.lane.b32.xlu0 %v493_v7, %s2388_s24 }
  0x34   : > { %634 = vrot.lane.b32.xlu1 %v2494_v2, %s2395_s30  ;;  %638 = vrot.lane.b32.xlu0 %v2491_v1, %s2395_s30 }
  0x38   : > { %2269 = vrot.lane.b32.xlu1 %v2268_v8, %s2389_s25  ;;  %2264 = vrot.lane.b32.xlu0 %v2268_v8, %s2387_s23  ;;  %s470_s25 = scalar_lea.vmem %s3319_s3, %s2526_s12 }
  0x3c   : > { %2279 = vrot.lane.b32.xlu1 %v2268_v8, %s2390_s26  ;;  %2274 = vrot.lane.b32.xlu0 %v2268_v8, %s2391_s27  ;;  %s482_s27 = scalar_lea.vmem %s3322_s6, %s2526_s12 }
  0x40   : > { %2289 = vrot.lane.b32.xlu1 %v2268_v8, %s2392_s28  ;;  %2284 = vrot.lane.b32.xlu0 %v2268_v8, %s2393_s29  ;;  %s478_s28 = scalar_lea.vmem %s3321_s5, %s2526_s12 }
  0x44   : > { %640 = vrot.lane.b32.xlu0 %v2499_v4, %s2395_s30  ;;  %642 = vrot.lane.b32.xlu1 %v493_v7, %s2395_s30 }
  0x48   : > { %655 = vperm.xlu0 %2293, %v2533_v10  }
  0x86   : > { %v2536_v11 = vpop.permute.xlu1 %2234  ;;  %v2538_v12 = vpop.permute.xlu0 %2224 }
  0x87   : > { %v2227_v13 = vunpack.i.h.bf16 %v2538_v12  ;;  %v2226_v14 = vunpack.i.l.bf16 %v2538_v12  ;;  %v2237_v15 = vunpack.i.h.bf16 %v2536_v11  ;;  %v2236_v16 = vunpack.i.l.bf16 %v2536_v11 }
  0x89   : > { %v513_v17 = vsel %vm511_vm0, %v2226_v14, %v2227_v13  ;;  %v532_v25 = vsel %vm530_vm2, %v2236_v16, %v2237_v15 }
  0x8a   : > { %v2547_v18 = vpop.permute.xlu1 %2239  ;;  %v2549_v19 = vpop.permute.xlu0 %2229  ;;  %v1948_v20 = vpack.c.bf16 %v513_v17, %v2488_v0 }
  0x8b   : > { %v2242_v21 = vunpack.i.h.bf16 %v2547_v18  ;;  %v2241_v22 = vunpack.i.l.bf16 %v2547_v18  ;;  %v2231_v23 = vunpack.i.l.bf16 %v2549_v19  ;;  %v2232_v62 = vunpack.i.h.bf16 %v2549_v19 }
  0x8c   : > { %1949 = vmatprep.subr.bf16.mxu1 %v1948_v20 }
  0x8d   : > { %v512_v24 = vsel %vm511_vm0, %v2231_v23, %v2226_v14  ;;  %v551_v26 = vsel %vm549_vm1, %v2241_v22, %v2242_v21  ;;  %v514_v3 = vsel %vm511_vm0, %v2227_v13, %v2232_v62 }
  0x8e   : > { %v540_v27 = vpop.permute.xlu1 %539  ;;  %v521_v28 = vpop.permute.xlu0 %520  ;;  %v1950_v29 = vpack.c.bf16 %v512_v24, %v2494_v2  ;;  %v1952_v30 = vpack.c.bf16 %v551_v26, %v532_v25  ;;  %v1966_v19 = vpack.c.bf16 %v514_v3, %v2491_v1  ;;  %v908_v3 = vld [vmem:[%s3323_s7 + $0x48] sm:$0xff] }
  0x8f   : > { %v550_v31 = vsel %vm549_vm1, %v540_v27, %v2241_v22  ;;  %v531_v32 = vsel %vm530_vm2, %v521_v28, %v2236_v16  ;;  %v494_v16 = vld [vmem:[%s462_s19] sm:$0xff]  ;;  %s2406_s19 = smov 116  }
  0x90   : > { %1951 = vmatpush1.bf16.msra.mxu1 %v1950_v29  ;;  %v1954_v33 = vpack.c.bf16 %v550_v31, %v531_v32 }
  0x91   : > { %1953 = vmatprep.subr.bf16.mxu1 %v1952_v30 }
  0x92   : > { %v2565_v34 = vpop.permute.xlu1 %2249  ;;  %v2567_v35 = vpop.permute.xlu0 %2244 }
  0x93   : > { %v2252_v36 = vunpack.i.h.bf16 %v2565_v34  ;;  %v2251_v37 = vunpack.i.l.bf16 %v2565_v34  ;;  %v2247_v38 = vunpack.i.h.bf16 %v2567_v35  ;;  %v2246_v39 = vunpack.i.l.bf16 %v2567_v35 }
  0x94   : > { %1955 = vmatpush1.bf16.msra.mxu1 %v1954_v33 }
  0x95   : > { %v570_v40 = vsel %vm568_vm4, %v2246_v39, %v2247_v38  ;;  %v589_v41 = vsel %vm587_vm3, %v2251_v37, %v2252_v36 }
  0x96   : > { %v578_v42 = vpop.permute.xlu1 %577  ;;  %v559_v43 = vpop.permute.xlu0 %558  ;;  %v1956_v44 = vpack.c.bf16 %v589_v41, %v570_v40 }
  0x97   : > { %v588_v45 = vsel %vm587_vm3, %v578_v42, %v2251_v37  ;;  %v569_v46 = vsel %vm568_vm4, %v559_v43, %v2246_v39 }
  0x98   : > { %v1958_v47 = vpack.c.bf16 %v588_v45, %v569_v46  ;;  %1957 = vmatprep.subr.bf16.mxu1 %v1956_v44 }
  0x9a   : > { %v2581_v48 = vpop.permute.xlu1 %2259  ;;  %v2583_v49 = vpop.permute.xlu0 %2254  ;;  %1959 = vmatpush1.bf16.msra.mxu1 %v1958_v47 }
  0x9b   : > { %v2262_v50 = vunpack.i.h.bf16 %v2581_v48  ;;  %v2261_v51 = vunpack.i.l.bf16 %v2581_v48  ;;  %v2257_v52 = vunpack.i.h.bf16 %v2583_v49  ;;  %v2256_v53 = vunpack.i.l.bf16 %v2583_v49 }
  0x9c   : > { %v2397_v49 = vmov 1  }
  0x9d   : > { %v608_v54 = vsel %vm606_vm6, %v2256_v53, %v2257_v52  ;;  %v627_v55 = vsel %vm625_vm5, %v2261_v51, %v2262_v50  ;;  %2294 = vset.pattern.permute.xlu1 %v2397_v49 }
  0x9e   : > { %v616_v56 = vpop.permute.xlu1 %615  ;;  %v597_v57 = vpop.permute.xlu0 %596  ;;  %v1960_v58 = vpack.c.bf16 %v627_v55, %v608_v54 }
  0x9f   : > { %v626_v59 = vsel %vm625_vm5, %v616_v56, %v2261_v51  ;;  %v607_v60 = vsel %vm606_vm6, %v597_v57, %v2256_v53  ;;  %v902_v56 = vld [vmem:[%s3323_s7 + $0x18] sm:$0xff]  ;;  %v899_v57 = vld [vmem:[%s3323_s7] sm:$0xff] }
  0xa0   : > { %v1962_v61 = vpack.c.bf16 %v626_v59, %v607_v60  ;;  %1961 = vmatprep.subr.bf16.mxu1 %v1960_v58  ;;  %v901_v59 = vld [vmem:[%s3323_s7 + $0x10] sm:$0xff]  ;;  %v904_v60 = vld [vmem:[%s3323_s7 + $0x28] sm:$0xff] }
  0xa2   : > { %v637_v63 = vpop.permute.xlu1 %636  ;;  %v510_v0 = vpop.permute.xlu0 %509  ;;  %1963 = vmatpush1.bf16.msra.mxu1 %v1962_v61  ;;  %v906_v61 = vld [vmem:[%s3323_s7 + $0x38] sm:$0xff] }
  0xa3   : > { %v515_v2 = vsel %vm511_vm0, %v2232_v62, %v510_v0  ;;  %v1982_v62 = vpack.c.bf16 %v901_v59, %v899_v57  ;;  %v903_v0 = vld [vmem:[%s3323_s7 + $0x20] sm:$0xff] }
  0xa4   : > { %v1964_v17 = vpack.c.bf16 %v515_v2, %v2499_v4  ;;  %v905_v2 = vld [vmem:[%s3323_s7 + $0x30] sm:$0xff] }
  0xa6   : > { %v635_v5 = vpop.permute.xlu1 %634  ;;  %v639_v7 = vpop.permute.xlu0 %638 }
  0xa7   : > { %v646_v8 = vsel %vm644_vm7, %v637_v63, %v639_v7  ;;  %v645_v14 = vsel %vm644_vm7, %v635_v5, %v637_v63  ;;  %v1984_v63 = vpack.c.bf16 %v906_v61, %v904_v60  ;;  %v910_v5 = vld [vmem:[%s3323_s7 + $0x58] sm:$0xff]  ;;  %v488_v60 = vld [vmem:[%s3326_s10 + $0x8] sm:$0x77] }
  0xa8   : > { %678 = vmatprep.subr.mxu1 %v646_v8  ;;  %v1988_v8 = vpack.c.bf16 %v910_v5, %v908_v3 }
  0xa9   : > { %679 = vmatpush1.msra.mxu1 %v645_v14  ;;  %v907_v14 = vld [vmem:[%s3323_s7 + $0x40] sm:$0xff] }
  0xaa   : > { %v2270_v20 = vpop.permute.xlu1 %2269  ;;  %v2265_v22 = vpop.permute.xlu0 %2264  ;;  %1965 = vmatprep.subr.bf16.mxu1 %v1964_v17  ;;  %1828 = vmatmul.mubr.msk.f32.vlgmr.msra.gmra.mrb[0].mxu1 %vm658_vm8, %v494_v16  ;;  %v912_v17 = vld [vmem:[%s3323_s7 + $0x68] sm:$0xff] }
  0xab   : > { %v2272_v12 = vunpack.i.h.bf16 %v2270_v20  ;;  %v2271_v13 = vunpack.i.l.bf16 %v2270_v20  ;;  %v2267_v23 = vunpack.i.h.bf16 %v2265_v22  ;;  %v2266_v24 = vunpack.i.l.bf16 %v2265_v22  ;;  %1967 = vmatpush1.bf16.msra.mxu1 %v1966_v19  ;;  %797 = vmatprep.mubr.f32.mxu1 %v2394_v6  ;;  %v914_v19 = vld [vmem:[%s3323_s7 + $0x78] sm:$0xff] }
  0xac   : > { %v1992_v22 = vpack.c.bf16 %v914_v19, %v912_v17 }
  0xad   : > { %v552_v4 = vsel %vm549_vm1, %v2242_v21, %v2271_v13  ;;  %v533_v1 = vsel %vm530_vm2, %v2237_v15, %v2266_v24  ;;  %v534_v25 = vsel %vm530_vm2, %v2266_v24, %v2267_v23  ;;  %v553_v26 = vsel %vm549_vm1, %v2271_v13, %v2272_v12  ;;  %v911_v12 = vld [vmem:[%s3323_s7 + $0x60] sm:$0xff]  ;;  %v913_v13 = vld [vmem:[%s3323_s7 + $0x70] sm:$0xff]  ;;  %v916_v23 = vld [vmem:[%s3323_s7 + $0x88] sm:$0xff] }
  0xae   : > { %v1970_v27 = vpack.c.bf16 %v552_v4, %v533_v1  ;;  %v2280_v28 = vpop.permute.xlu1 %2279  ;;  %v2275_v29 = vpop.permute.xlu0 %2274  ;;  %v1968_v30 = vpack.c.bf16 %v553_v26, %v534_v25  ;;  %v918_v24 = vld [vmem:[%s3323_s7 + $0x98] sm:$0xff]  ;;  %v1994_v4 = vpack.c.bf16 %v913_v13, %v911_v12  ;;  %v915_v25 = vld [vmem:[%s3323_s7 + $0x80] sm:$0xff]  ;;  %v917_v26 = vld [vmem:[%s3323_s7 + $0x90] sm:$0xff]  ;;  %vm1472_vm1 = vcmask 990208  }
  0xaf   : > { %v2282_v31 = vunpack.i.h.bf16 %v2280_v28  ;;  %v2281_v32 = vunpack.i.l.bf16 %v2280_v28  ;;  %v2277_v33 = vunpack.i.h.bf16 %v2275_v29  ;;  %v2276_v37 = vunpack.i.l.bf16 %v2275_v29  ;;  %v922_v28 = vld [vmem:[%s3323_s7 + $0xb8] sm:$0xff] }
  0xb0   : > { %1969 = vmatprep.subr.bf16.mxu1 %v1968_v30  ;;  %v1996_v1 = vpack.c.bf16 %v918_v24, %v916_v23  ;;  %v1998_v29 = vpack.c.bf16 %v917_v26, %v915_v25 }
  0xb1   : > { %v590_v18 = vsel %vm587_vm3, %v2252_v36, %v2281_v32  ;;  %v571_v11 = vsel %vm568_vm4, %v2247_v38, %v2276_v37  ;;  %1971 = vmatpush1.bf16.msra.mxu1 %v1970_v27  ;;  %v572_v15 = vsel %vm568_vm4, %v2276_v37, %v2277_v33  ;;  %v591_v21 = vsel %vm587_vm3, %v2281_v32, %v2282_v31  ;;  %v920_v27 = vld [vmem:[%s3323_s7 + $0xa8] sm:$0xff]  ;;  %v919_v31 = vld [vmem:[%s3323_s7 + $0xa0] sm:$0xff]  ;;  %v921_v32 = vld [vmem:[%s3323_s7 + $0xb0] sm:$0xff] }
  0xb2   : > { %v1974_v39 = vpack.c.bf16 %v590_v18, %v571_v11  ;;  %v2290_v40 = vpop.permute.xlu1 %2289  ;;  %v2285_v41 = vpop.permute.xlu0 %2284  ;;  %v1972_v42 = vpack.c.bf16 %v591_v21, %v572_v15  ;;  %v2000_v30 = vpack.c.bf16 %v922_v28, %v920_v27  ;;  %v924_v33 = vld [vmem:[%s3323_s7 + $0xc8] sm:$0xff]  ;;  %v926_v37 = vld [vmem:[%s3323_s7 + $0xd8] sm:$0xff]  ;;  %v2002_v18 = vpack.c.bf16 %v921_v32, %v919_v31  ;;  %v923_v15 = vld [vmem:[%s3323_s7 + $0xc0] sm:$0xff] }
  0xb3   : > { %v2292_v43 = vunpack.i.h.bf16 %v2290_v40  ;;  %v2291_v44 = vunpack.i.l.bf16 %v2290_v40  ;;  %v2287_v45 = vunpack.i.h.bf16 %v2285_v41  ;;  %v2286_v46 = vunpack.i.l.bf16 %v2285_v41  ;;  %v925_v21 = vld [vmem:[%s3323_s7 + $0xd0] sm:$0xff]  ;;  %v930_v40 = vld [vmem:[%s3323_s7 + $0xf8] sm:$0xff] }
  0xb4   : > { %1973 = vmatprep.subr.bf16.mxu1 %v1972_v42  ;;  %v2004_v11 = vpack.c.bf16 %v926_v37, %v924_v33  ;;  %v2006_v41 = vpack.c.bf16 %v925_v21, %v923_v15  ;;  %v936_v37 = vld [vmem:[%s3323_s7 + $0x128] sm:$0xff]  ;;  %v935_v15 = vld [vmem:[%s3323_s7 + $0x120] sm:$0xff]  ;;  %v937_v21 = vld [vmem:[%s3323_s7 + $0x130] sm:$0xff] }
  0xb5   : > { %v628_v34 = vsel %vm625_vm5, %v2262_v50, %v2291_v44  ;;  %v609_v35 = vsel %vm606_vm6, %v2257_v52, %v2286_v46  ;;  %1975 = vmatpush1.bf16.msra.mxu1 %v1974_v39  ;;  %v610_v36 = vsel %vm606_vm6, %v2286_v46, %v2287_v45  ;;  %v629_v38 = vsel %vm625_vm5, %v2291_v44, %v2292_v43  ;;  %v900_v52 = vld [vmem:[%s3323_s7 + $0x8] sm:$0xff]  ;;  %v927_v43 = vld [vmem:[%s3323_s7 + $0xe0] sm:$0xff]  ;;  %v929_v44 = vld [vmem:[%s3323_s7 + $0xf0] sm:$0xff] }
  0xb6   : > { %v1978_v47 = vpack.c.bf16 %v628_v34, %v609_v35  ;;  %v641_v51 = vpop.permute.xlu0 %640  ;;  %v1976_v53 = vpack.c.bf16 %v629_v38, %v610_v36  ;;  %v643_v54 = vpop.permute.xlu1 %642  ;;  %v2398_v50 = vmov 2   ;;  %v1980_v58 = vpack.c.bf16 %v902_v56, %v900_v52  ;;  %v928_v39 = vld [vmem:[%s3323_s7 + $0xe8] sm:$0xff]  ;;  %v934_v46 = vld [vmem:[%s3323_s7 + $0x118] sm:$0xff]  ;;  %v931_v36 = vld [vmem:[%s3323_s7 + $0x100] sm:$0xff] }
  0xb7   : > { %v648_v55 = vsel %vm644_vm7, %v641_v51, %v643_v54  ;;  %v647_v48 = vsel %vm644_vm7, %v639_v7, %v641_v51  ;;  %2295 = vset.pattern.permute.xlu0 %v2398_v50  ;;  %v1986_v7 = vpack.c.bf16 %v905_v2, %v903_v0  ;;  %v2008_v42 = vpack.c.bf16 %v930_v40, %v928_v39  ;;  %v932_v45 = vld [vmem:[%s3323_s7 + $0x108] sm:$0xff]  ;;  %v933_v38 = vld [vmem:[%s3323_s7 + $0x110] sm:$0xff]  ;;  %v2756_v56 = vld [vmem:[%s3326_s10] sm:$0x77] }
  0xb8   : > { %1977 = vmatprep.subr.bf16.mxu1 %v1976_v53  ;;  %1981 = vmatprep.subr.bf16.mxu0 %v1980_v58  ;;  %v2010_v34 = vpack.c.bf16 %v929_v44, %v927_v43  ;;  %v2012_v35 = vpack.c.bf16 %v934_v46, %v932_v45  ;;  %v806_v51 = vlaneseq  ;;  %v2018_v39 = vpack.c.bf16 %v937_v21, %v935_v15  ;;  %v940_v40 = vld [vmem:[%s3323_s7 + $0x148] sm:$0xff]  ;;  %v939_v43 = vld [vmem:[%s3323_s7 + $0x140] sm:$0xff]  ;;  %v941_v44 = vld [vmem:[%s3323_s7 + $0x150] sm:$0xff] }
  0xb9   : > { %1979 = vmatpush1.bf16.msra.mxu1 %v1978_v47  ;;  %1983 = vmatpush1.bf16.msra.mxu0 %v1982_v62  ;;  %v2014_v47 = vpack.c.bf16 %v933_v38, %v931_v36  ;;  %v2022_v45 = vpack.c.bf16 %v941_v44, %v939_v43  ;;  %v944_v46 = vld [vmem:[%s3323_s7 + $0x168] sm:$0xff]  ;;  %v943_v36 = vld [vmem:[%s3323_s7 + $0x160] sm:$0xff]  ;;  %v945_v38 = vld [vmem:[%s3323_s7 + $0x170] sm:$0xff] }
  0xba   : > { %749 = vmatprep.subr.mxu1 %v648_v55  ;;  %1985 = vmatprep.subr.bf16.mxu0 %v1984_v63  ;;  %v2749_v55 = vshrl.u32 %v806_v51, 7  ;;  %v948_v51 = vld [vmem:[%s3323_s7 + $0x188] sm:$0xff] }
  0xbc   : > { %v812_v52 = vsub.s32 4, %v2749_v55 }
  0xbd   : > { %750 = vmatpush1.msra.mxu1 %v647_v48  ;;  %1987 = vmatpush1.bf16.msra.mxu0 %v1986_v7  ;;  %v808_v48 = vsub.s32 0, %v2749_v55 }
  0xbe   : > { %1829 = vmatmul.mubr.msk.f32.vlgmr.msra.gmra.mrb[2].mxu1 %vm658_vm8, %v494_v16  ;;  %v909_v16 = vld [vmem:[%s3323_s7 + $0x50] sm:$0xff]  ;;  %1989 = vmatprep.subr.bf16.mxu0 %v1988_v8  ;;  %v813_v58 = vrot.slane %v2756_v56, %v812_v52  ;;  %v821_v3 = vrot.slane %v488_v60, %v812_v52 }
  0xbf   : > { %v1990_v20 = vpack.c.bf16 %v909_v16, %v907_v14  ;;  %v809_v59 = vrot.slane %v2756_v56, %v808_v48  ;;  %v817_v0 = vrot.slane %v488_v60, %v808_v48  ;;  %v949_v52 = vld [vmem:[%s3323_s7 + $0x190] sm:$0xff]  ;;  %v951_v60 = vld [vmem:[%s3323_s7 + $0x1a0] sm:$0xff]  ;;  %1889 = vmatprep.mubr.msk.f32.mxu1 %vm2404_vm9, %v2394_v6 }
  0xc0   : > { %v833_v63 = vrot.slane %v813_v58, %v808_v48  ;;  %v841_v19 = vrot.slane %v821_v3, %v808_v48 }
  0xc1   : > { %1991 = vmatpush1.bf16.msra.mxu0 %v1990_v20  ;;  %v829_v2 = vrot.slane %v809_v59, %v808_v48  ;;  %v837_v14 = vrot.slane %v817_v0, %v808_v48  ;;  %v956_v0 = vld [vmem:[%s3323_s7 + $0x1c8] sm:$0xff] }
  0xc2   : > { %1993 = vmatprep.subr.bf16.mxu0 %v1992_v22 }
  0xc5   : > { %1995 = vmatpush1.bf16.msra.mxu0 %v1994_v4 }
  0xc6   : > { %1997 = vmatprep.subr.bf16.mxu0 %v1996_v1 }
  0xc7   : > { %v656_v57 = vpop.permute.xlu0 %655 }
  0xc9   : > { %1999 = vmatpush1.bf16.msra.mxu0 %v1998_v29 }
  0xca   : > { %2001 = vmatprep.subr.bf16.mxu0 %v2000_v30 }
  0xcd   : > { %2003 = vmatpush1.bf16.msra.mxu0 %v2002_v18  ;;  %v938_v18 = vld [vmem:[%s3323_s7 + $0x138] sm:$0xff] }
  0xce   : > { %2005 = vmatprep.subr.bf16.mxu0 %v2004_v11  ;;  %v2016_v11 = vpack.c.bf16 %v938_v18, %v936_v37 }
  0xd1   : > { %2007 = vmatpush1.bf16.msra.mxu0 %v2006_v41  ;;  %v942_v41 = vld [vmem:[%s3323_s7 + $0x158] sm:$0xff] }
  0xd2   : > { %2009 = vmatprep.subr.bf16.mxu0 %v2008_v42  ;;  %v2020_v42 = vpack.c.bf16 %v942_v41, %v940_v40 }
  0xd5   : > { %2011 = vmatpush1.bf16.msra.mxu0 %v2010_v34  ;;  %v946_v34 = vld [vmem:[%s3323_s7 + $0x178] sm:$0xff] }
  0xd6   : > { %2013 = vmatprep.subr.bf16.mxu0 %v2012_v35  ;;  %v2024_v35 = vpack.c.bf16 %v946_v34, %v944_v46 }
  0xd9   : > { %2015 = vmatpush1.bf16.msra.mxu0 %v2014_v47  ;;  %v2026_v47 = vpack.c.bf16 %v945_v38, %v943_v36  ;;  %v970_v36 = vld [vmem:[%s3323_s7 + $0x238] sm:$0xff] }
  0xda   : > { %2017 = vmatprep.subr.bf16.mxu0 %v2016_v11 }
  0xdd   : > { %2019 = vmatpush1.bf16.msra.mxu0 %v2018_v39 }
  0xde   : > { %2021 = vmatprep.subr.bf16.mxu0 %v2020_v42 }
  0xe1   : > { %2023 = vmatpush1.bf16.msra.mxu0 %v2022_v45 }
  0xe2   : > { %2025 = vmatprep.subr.bf16.mxu0 %v2024_v35  ;;  %v968_v35 = vld [vmem:[%s3323_s7 + $0x228] sm:$0xff] }
  0xe5   : > { %2027 = vmatpush1.bf16.msra.mxu0 %v2026_v47 }
 0x17d   : > { %v728_v53 = vpop.f32.mrb[0].mxu1 }
 0x17e   : > { %v730_v54 = vpop.f32.mrb[1].mxu1  ;;  %v2763_v61 = vadd.f32 %v728_v53, %v656_v57  ;;  %v950_v53 = vld [vmem:[%s3323_s7 + $0x198] sm:$0xff] }
 0x17f   : > { %v2765_v62 = vadd.f32 %v730_v54, %v656_v57  ;;  %v947_v54 = vld [vmem:[%s3323_s7 + $0x180] sm:$0xff]  ;;  %v2028_v48 = vpack.c.bf16 %v950_v53, %v948_v51  ;;  %v2048_v53 = vpack.c.bf16 %v970_v36, %v968_v35  ;;  %v1001_v36 = vld [vmem:[%s3323_s7 + $0x330] sm:$0xff] }
 0x180   : > { %v852_v7 = vmul.f32 %v2763_v61, %v2763_v61  ;;  %v842_v16 = vmul.f32 %v829_v2, %v2763_v61  ;;  %v2030_v58 = vpack.c.bf16 %v949_v52, %v947_v54  ;;  %v967_v54 = vld [vmem:[%s3323_s7 + $0x220] sm:$0xff] }
 0x181   : > { %v853_v5 = vmul.f32 %v2765_v62, %v2765_v62  ;;  %v843_v8 = vmul.f32 %v833_v63, %v2765_v62  ;;  %2029 = vmatprep.subr.bf16.mxu0 %v2028_v48  ;;  %v969_v48 = vld [vmem:[%s3323_s7 + $0x230] sm:$0xff]  ;;  %v999_v35 = vld [vmem:[%s3323_s7 + $0x320] sm:$0xff] }
 0x182   : > { %v856_v13 = vmul.f32 %v852_v7, %v829_v2  ;;  %v958_v2 = vld [vmem:[%s3323_s7 + $0x1d8] sm:$0xff]  ;;  %2031 = vmatpush1.bf16.msra.mxu0 %v2030_v58  ;;  %v955_v7 = vld [vmem:[%s3323_s7 + $0x1c0] sm:$0xff]  ;;  %v2050_v58 = vpack.c.bf16 %v969_v48, %v967_v54  ;;  %v1005_v48 = vld [vmem:[%s3323_s7 + $0x350] sm:$0xff] }
 0x183   : > { %v857_v20 = vmul.f32 %v853_v5, %v833_v63  ;;  %v846_v1 = vadd.f32 %v843_v8, %v842_v16  ;;  %v953_v63 = vld [vmem:[%s3323_s7 + $0x1b0] sm:$0xff]  ;;  %v2036_v5 = vpack.c.bf16 %v958_v2, %v956_v0  ;;  %v960_v16 = vld [vmem:[%s3323_s7 + $0x1e8] sm:$0xff]  ;;  %v978_v2 = vld [vmem:[%s3323_s7 + $0x278] sm:$0xff] }
 0x184   : > { %v2034_v3 = vpack.c.bf16 %v953_v63, %v951_v60  ;;  %v957_v8 = vld [vmem:[%s3323_s7 + $0x1d0] sm:$0xff]  ;;  %v971_v60 = vld [vmem:[%s3323_s7 + $0x240] sm:$0xff]  ;;  %v976_v0 = vld [vmem:[%s3323_s7 + $0x268] sm:$0xff] }
 0x185   : > { %v860_v29 = vadd.f32 %v857_v20, %v856_v13  ;;  %v959_v20 = vld [vmem:[%s3323_s7 + $0x1e0] sm:$0xff]  ;;  %v973_v63 = vld [vmem:[%s3323_s7 + $0x250] sm:$0xff] }
 0x186   : > { %v1003_v54 = vld [vmem:[%s3323_s7 + $0x340] sm:$0xff] }
 0x191   : > { %v799_v17 = vpop.f32.mrb[2].mxu1 }
 0x192   : > { %v2773_v22 = vadd.f32 %v799_v17, %v656_v57  ;;  %v801_v12 = vpop.f32.mrb[3].mxu1  ;;  %v962_v17 = vld [vmem:[%s3323_s7 + $0x1f8] sm:$0xff] }
 0x193   : > { %v2775_v23 = vadd.f32 %v801_v12, %v656_v57  ;;  %v954_v57 = vld [vmem:[%s3323_s7 + $0x1b8] sm:$0xff]  ;;  %v961_v12 = vld [vmem:[%s3323_s7 + $0x1f0] sm:$0xff] }
 0x194   : > { %v844_v24 = vmul.f32 %v837_v14, %v2773_v22  ;;  %v854_v4 = vmul.f32 %v2773_v22, %v2773_v22  ;;  %v2042_v13 = vpack.c.bf16 %v961_v12, %v959_v20  ;;  %v979_v20 = vld [vmem:[%s3323_s7 + $0x280] sm:$0xff]  ;;  %v981_v12 = vld [vmem:[%s3323_s7 + $0x290] sm:$0xff] }
 0x195   : > { %v855_v25 = vmul.f32 %v2775_v23, %v2775_v23  ;;  %v845_v26 = vmul.f32 %v841_v19, %v2775_v23 }
 0x196   : > { %v847_v27 = vadd.f32 %v846_v1, %v844_v24  ;;  %v858_v28 = vmul.f32 %v854_v4, %v837_v14  ;;  %v2038_v14 = vpack.c.bf16 %v957_v8, %v955_v7  ;;  %v964_v24 = vld [vmem:[%s3323_s7 + $0x208] sm:$0xff]  ;;  %v966_v4 = vld [vmem:[%s3323_s7 + $0x218] sm:$0xff]  ;;  %v975_v7 = vld [vmem:[%s3323_s7 + $0x260] sm:$0xff] }
 0x197   : > { %v859_v30 = vmul.f32 %v855_v25, %v841_v19  ;;  %v2040_v19 = vpack.c.bf16 %v962_v17, %v960_v16  ;;  %v2044_v1 = vpack.c.bf16 %v966_v4, %v964_v24  ;;  %v977_v8 = vld [vmem:[%s3323_s7 + $0x270] sm:$0xff]  ;;  %v982_v16 = vld [vmem:[%s3323_s7 + $0x298] sm:$0xff]  ;;  %v2062_v4 = vpack.c.bf16 %v981_v12, %v979_v20  ;;  %v1020_v12 = vld [vmem:[%s3323_s7 + $0x3c8] sm:$0xff] }
 0x198   : > { %v848_v31 = vadd.f32 %v847_v27, %v845_v26  ;;  %v861_v32 = vadd.f32 %v860_v29, %v858_v28  ;;  %v2058_v17 = vpack.c.bf16 %v977_v8, %v975_v7  ;;  %v986_v24 = vld [vmem:[%s3323_s7 + $0x2b8] sm:$0xff]  ;;  %v1013_v7 = vld [vmem:[%s3323_s7 + $0x390] sm:$0xff]  ;;  %v1016_v8 = vld [vmem:[%s3323_s7 + $0x3a8] sm:$0xff] }
 0x199   : > { %v1017_v20 = vld [vmem:[%s3323_s7 + $0x3b0] sm:$0xff] }
 0x19a   : > { %849 = vadd.xlane.f32.xlu1 %v848_v31  ;;  %v862_v33 = vadd.f32 %v861_v32, %v859_v30 }
 0x19c   : > { %863 = vadd.xlane.f32.xlu0 %v862_v33 }
 0x1ab   : > { %880 = vperm.xlu1 %2294, %v2533_v10  }
 0x1af   : > { %2331 = vset.pattern.permute.xlu1 %v2396_v9 }
 0x1b2   : > { %888 = vperm.xlu0 %2295, %v2533_v10   ;;  %v952_v10 = vld [vmem:[%s3323_s7 + $0x1a8] sm:$0xff] }
 0x1b3   : > { %v2032_v59 = vpack.c.bf16 %v954_v57, %v952_v10  ;;  %v972_v10 = vld [vmem:[%s3323_s7 + $0x248] sm:$0xff]  ;;  %v974_v57 = vld [vmem:[%s3323_s7 + $0x258] sm:$0xff] }
 0x1b5   : > { %2033 = vmatprep.subr.bf16.mxu0 %v2032_v59  ;;  %v2052_v59 = vpack.c.bf16 %v974_v57, %v972_v10  ;;  %v1010_v10 = vld [vmem:[%s3323_s7 + $0x378] sm:$0xff]  ;;  %v2086_v57 = vpack.c.bf16 %v1005_v48, %v1003_v54 }
 0x1b6   : > { %2332 = vset.pattern.permute.xlu0 %v2397_v49  ;;  %2035 = vmatpush1.bf16.msra.mxu0 %v2034_v3  ;;  %v2054_v3 = vpack.c.bf16 %v973_v63, %v971_v60  ;;  %v1009_v60 = vld [vmem:[%s3323_s7 + $0x370] sm:$0xff]  ;;  %v1012_v63 = vld [vmem:[%s3323_s7 + $0x388] sm:$0xff] }
 0x1b7   : > { %2037 = vmatprep.subr.bf16.mxu0 %v2036_v5  ;;  %v2056_v5 = vpack.c.bf16 %v978_v2, %v976_v0  ;;  %v1014_v0 = vld [vmem:[%s3323_s7 + $0x398] sm:$0xff] }
 0x1ba   : > { %2039 = vmatpush1.bf16.msra.mxu0 %v2038_v14  ;;  %v980_v14 = vld [vmem:[%s3323_s7 + $0x288] sm:$0xff] }
 0x1bb   : > { %2041 = vmatprep.subr.bf16.mxu0 %v2040_v19  ;;  %v2060_v19 = vpack.c.bf16 %v982_v16, %v980_v14  ;;  %v1018_v14 = vld [vmem:[%s3323_s7 + $0x3b8] sm:$0xff] }
 0x1be   : > { %2043 = vmatpush1.bf16.msra.mxu0 %v2042_v13  ;;  %v984_v13 = vld [vmem:[%s3323_s7 + $0x2a8] sm:$0xff] }
 0x1bf   : > { %2045 = vmatprep.subr.bf16.mxu0 %v2044_v1  ;;  %v2064_v1 = vpack.c.bf16 %v986_v24, %v984_v13  ;;  %v1022_v13 = vld [vmem:[%s3323_s7 + $0x3d8] sm:$0xff] }
 0x227   : > { %v850_v25 = vpop.xlane.xlu1 %849 }
 0x228   : > { %v851_v26 = vmul.f32 0.0034722222, %v850_v25  ;;  %v983_v25 = vld [vmem:[%s3323_s7 + $0x2a0] sm:$0xff] }
 0x229   : > { %v864_v27 = vpop.xlane.xlu0 %863 }
 0x22a   : > { %v865_v28 = vmul.f32 0.0034722222, %v864_v27  ;;  %v866_v29 = vmul.f32 %v851_v26, %v851_v26  ;;  %v869_v33 = vsub.f32 %v2763_v61, %v851_v26  ;;  %v871_v37 = vsub.f32 %v2773_v22, %v851_v26  ;;  %v988_v27 = vld [vmem:[%s3323_s7 + $0x2c8] sm:$0xff] }
 0x22b   : > { %v872_v18 = vsub.f32 %v2775_v23, %v851_v26  ;;  %v870_v11 = vsub.f32 %v2765_v62, %v851_v26  ;;  %v2881_v21 = vpop.permute.xlu1 %880  ;;  %v963_v62 = vld [vmem:[%s3323_s7 + $0x200] sm:$0xff]  ;;  %v965_v23 = vld [vmem:[%s3323_s7 + $0x210] sm:$0xff] }
 0x22c   : > { %v867_v30 = vsub.f32 %v865_v28, %v866_v29  ;;  %v2046_v51 = vpack.c.bf16 %v965_v23, %v963_v62  ;;  %v985_v26 = vld [vmem:[%s3323_s7 + $0x2b0] sm:$0xff]  ;;  %v990_v28 = vld [vmem:[%s3323_s7 + $0x2d8] sm:$0xff]  ;;  %v1000_v23 = vld [vmem:[%s3323_s7 + $0x328] sm:$0xff] }
 0x22d   : > { %v2066_v29 = vpack.c.bf16 %v985_v26, %v983_v25  ;;  %v997_v62 = vld [vmem:[%s3323_s7 + $0x310] sm:$0xff]  ;;  %v1024_v26 = vld [vmem:[%s3323_s7 + $0x3e8] sm:$0xff] }
 0x22e   : > { %v868_v31 = vmax.f32 %v867_v30, 0.0  ;;  %v2068_v30 = vpack.c.bf16 %v990_v28, %v988_v27  ;;  %v1021_v25 = vld [vmem:[%s3323_s7 + $0x3d0] sm:$0xff]  ;;  %v1026_v27 = vld [vmem:[%s3323_s7 + $0x3f8] sm:$0xff] }
 0x230   : > { %v873_v32 = vadd.f32 1e-05, %v868_v31  ;;  %v987_v31 = vld [vmem:[%s3323_s7 + $0x2c0] sm:$0xff] }
 0x231   : > { %v2885_v43 = vpop.permute.xlu0 %888 }
 0x232   : > { %2372 = vrsqrt.f32 %v873_v32  ;;  %v989_v32 = vld [vmem:[%s3323_s7 + $0x2d0] sm:$0xff] }
 0x23c   : > { %v2373_v15 = vpop.eup %2372 }
 0x23d   : > { %v875_v39 = vmul.f32 %v2373_v15, %v869_v33  ;;  %v2883_v40 = vmul.f32 %v2373_v15, %v871_v37  ;;  %v878_v41 = vmul.f32 %v2373_v15, %v872_v18  ;;  %v876_v42 = vmul.f32 %v2373_v15, %v870_v11  ;;  %v992_v33 = vld [vmem:[%s3323_s7 + $0x2e8] sm:$0xff]  ;;  %v994_v37 = vld [vmem:[%s3323_s7 + $0x2f8] sm:$0xff]  ;;  %v991_v15 = vld [vmem:[%s3323_s7 + $0x2e0] sm:$0xff] }
 0x23e   : > { %v2070_v18 = vpack.c.bf16 %v989_v32, %v987_v31  ;;  %v2072_v11 = vpack.c.bf16 %v994_v37, %v992_v33  ;;  %v1023_v31 = vld [vmem:[%s3323_s7 + $0x3e0] sm:$0xff]  ;;  %v1025_v32 = vld [vmem:[%s3323_s7 + $0x3f0] sm:$0xff] }
 0x23f   : > { %v883_v44 = vmul.f32 %v2881_v21, %v875_v39  ;;  %v886_v61 = vmul.f32 %v2881_v21, %v878_v41  ;;  %v884_v22 = vmul.f32 %v2881_v21, %v876_v42  ;;  %v993_v39 = vld [vmem:[%s3323_s7 + $0x2f0] sm:$0xff]  ;;  %v996_v41 = vld [vmem:[%s3323_s7 + $0x308] sm:$0xff]  ;;  %v998_v42 = vld [vmem:[%s3323_s7 + $0x318] sm:$0xff]  ;;  %v2106_v33 = vpack.c.bf16 %v1025_v32, %v1023_v31 }
 0x241   : > { %v892_v45 = vadd.f32 %v2885_v43, %v884_v22  ;;  %v891_v46 = vadd.f32 %v2885_v43, %v883_v44  ;;  %v894_v34 = vadd.f32 %v2885_v43, %v886_v61  ;;  %v2074_v44 = vpack.c.bf16 %v993_v39, %v991_v15  ;;  %v995_v22 = vld [vmem:[%s3323_s7 + $0x300] sm:$0xff] }
 0x242   : > { %v2076_v61 = vpack.c.bf16 %v998_v42, %v996_v41 }
 0x243   : > { %v896_v38 = vmax.f32 %v892_v45, 0.0  ;;  %v895_v47 = vmax.f32 %v891_v46, 0.0  ;;  %v898_v52 = vmax.f32 %v894_v34, 0.0  ;;  %v1002_v45 = vld [vmem:[%s3323_s7 + $0x338] sm:$0xff]  ;;  %v2078_v46 = vpack.c.bf16 %v997_v62, %v995_v22 }
 0x244   : > { %v2080_v34 = vpack.c.bf16 %v1002_v45, %v1000_v23 }
 0x245   : > { %1091 = vmatprep.mubr.f32.mxu0 %v896_v38  ;;  %v1004_v38 = vld [vmem:[%s3323_s7 + $0x348] sm:$0xff] }
 0x246   : > { %1092 = vmatmul.mubr.f32.vlgmr.msra.gmra.mrb[0].mxu0 %v895_v47  ;;  %v1006_v47 = vld [vmem:[%s3323_s7 + $0x358] sm:$0xff] }
 0x247   : > { %2047 = vmatpush1.bf16.msra.mxu0 %v2046_v51  ;;  %1162 = vmatprep.mubr.f32.mxu0 %v898_v52  ;;  %v2082_v51 = vpack.c.bf16 %v1001_v36, %v999_v35  ;;  %v1008_v52 = vld [vmem:[%s3323_s7 + $0x368] sm:$0xff] }
 0x248   : > { %2049 = vmatprep.subr.bf16.mxu0 %v2048_v53  ;;  %v2084_v53 = vpack.c.bf16 %v1006_v47, %v1004_v38 }
 0x24b   : > { %2051 = vmatpush1.bf16.msra.mxu0 %v2050_v58  ;;  %v2088_v58 = vpack.c.bf16 %v1010_v10, %v1008_v52 }
 0x24c   : > { %2053 = vmatprep.subr.bf16.mxu0 %v2052_v59  ;;  %v1007_v59 = vld [vmem:[%s3323_s7 + $0x360] sm:$0xff] }
 0x24d   : > { %v2090_v2 = vpack.c.bf16 %v1009_v60, %v1007_v59 }
 0x24f   : > { %2055 = vmatpush1.bf16.msra.mxu0 %v2054_v3  ;;  %v2092_v3 = vpack.c.bf16 %v1014_v0, %v1012_v63 }
 0x250   : > { %2057 = vmatprep.subr.bf16.mxu0 %v2056_v5  ;;  %v1011_v5 = vld [vmem:[%s3323_s7 + $0x380] sm:$0xff] }
 0x251   : > { %v2094_v16 = vpack.c.bf16 %v1013_v7, %v1011_v5 }
 0x253   : > { %2059 = vmatpush1.bf16.msra.mxu0 %v2058_v17  ;;  %v2096_v17 = vpack.c.bf16 %v1018_v14, %v1016_v8 }
 0x254   : > { %2061 = vmatprep.subr.bf16.mxu0 %v2060_v19  ;;  %v1015_v19 = vld [vmem:[%s3323_s7 + $0x3a0] sm:$0xff] }
 0x255   : > { %v2098_v24 = vpack.c.bf16 %v1017_v20, %v1015_v19  ;;  %v1336_v20 = vld [vmem:[%s3324_s8 + $0x8] sm:$0xff] }
 0x257   : > { %2063 = vmatpush1.bf16.msra.mxu0 %v2062_v4  ;;  %v2100_v4 = vpack.c.bf16 %v1022_v13, %v1020_v12  ;;  %v1338_v12 = vld [vmem:[%s3324_s8 + $0x18] sm:$0xff]  ;;  %v1335_v13 = vld [vmem:[%s3324_s8] sm:$0xff] }
 0x258   : > { %2065 = vmatprep.subr.bf16.mxu0 %v2064_v1  ;;  %v1019_v1 = vld [vmem:[%s3323_s7 + $0x3c0] sm:$0xff] }
 0x259   : > { %v2102_v28 = vpack.c.bf16 %v1021_v25, %v1019_v1  ;;  %v1306_v25 = vsub.s32 1, %v2749_v55 }
 0x25b   : > { %2067 = vmatpush1.bf16.msra.mxu0 %v2066_v29  ;;  %v885_v29 = vmul.f32 %v2881_v21, %v2883_v40 }
 0x25c   : > { %2069 = vmatprep.subr.bf16.mxu0 %v2068_v30  ;;  %v2104_v30 = vpack.c.bf16 %v1026_v27, %v1024_v26  ;;  %v1307_v27 = vrot.slane %v2756_v56, %v1306_v25  ;;  %v1342_v56 = vld [vmem:[%s3324_s8 + $0x38] sm:$0xff] }
 0x25d   : > { %v893_v37 = vadd.f32 %v2885_v43, %v885_v29  ;;  %v3093_v43 = vld [vmem:[%s474_s21] sm:$0xff]  ;;  %s2408_s21 = smov 122  }
 0x25f   : > { %2071 = vmatpush1.bf16.msra.mxu0 %v2070_v18  ;;  %v897_v18 = vmax.f32 %v893_v37, 0.0  ;;  %v1340_v37 = vld [vmem:[%s3324_s8 + $0x28] sm:$0xff] }
 0x260   : > { %2073 = vmatprep.subr.bf16.mxu0 %v2072_v11  ;;  %v2399_v11 = vmov 0.0|0.0  }
 0x261   : > { %2108 = vmatprep.subr.bf16.mxu1 %v2399_v11 }
 0x263   : > { %2075 = vmatpush1.bf16.msra.mxu0 %v2074_v44 }
 0x264   : > { %2077 = vmatprep.subr.bf16.mxu0 %v2076_v61 }
 0x267   : > { %2079 = vmatpush1.bf16.msra.mxu0 %v2078_v46 }
 0x268   : > { %2081 = vmatprep.subr.bf16.mxu0 %v2080_v34 }
 0x26b   : > { %2083 = vmatpush1.bf16.msra.mxu0 %v2082_v51 }
 0x26c   : > { %2085 = vmatprep.subr.bf16.mxu0 %v2084_v53 }
 0x26f   : > { %2087 = vmatpush1.bf16.msra.mxu0 %v2086_v57 }
 0x270   : > { %2089 = vmatprep.subr.bf16.mxu0 %v2088_v58 }
 0x273   : > { %2091 = vmatpush1.bf16.msra.mxu0 %v2090_v2 }
 0x274   : > { %2093 = vmatprep.subr.bf16.mxu0 %v2092_v3 }
 0x277   : > { %2095 = vmatpush1.bf16.msra.mxu0 %v2094_v16 }
 0x278   : > { %2097 = vmatprep.subr.bf16.mxu0 %v2096_v17  ;;  %v1169_v17 = vld [vmem:[%s470_s25] sm:$0xff] }
 0x27b   : > { %2099 = vmatpush1.bf16.msra.mxu0 %v2098_v24  ;;  %v2120_v24 = vpack.c.bf16 %v1338_v12, %v1336_v20 }
 0x27c   : > { %2101 = vmatprep.subr.bf16.mxu0 %v2100_v4  ;;  %v1337_v4 = vld [vmem:[%s3324_s8 + $0x10] sm:$0xff] }
 0x27d   : > { %v2122_v1 = vpack.c.bf16 %v1337_v4, %v1335_v13 }
 0x27f   : > { %2103 = vmatpush1.bf16.msra.mxu0 %v2102_v28 }
 0x280   : > { %2105 = vmatprep.subr.bf16.mxu0 %v2104_v30 }
 0x283   : > { %2107 = vmatpush1.bf16.msra.mxu0 %v2106_v33 }
 0x286   : > { %1163 = vmatmul.mubr.f32.vlgmr.msra.gmra.mrb[0].mxu0 %v897_v18  ;;  %v2124_v18 = vpack.c.bf16 %v1342_v56, %v1340_v37 }
 0x359   : > { %v1164_v21 = vpop.f32.mrb[0].mxu0 }
 0x35a   : > { %v1166_v40 = vpop.f32.mrb[1].mxu0 }
 0x35b   : > { %1221 = vrot.lane.b32.xlu0 %v1166_v40, %s2400_s13  ;;  %v2296_v15 = vpack.i.bf16 %v1166_v40, %v1164_v21  ;;  %v1341_v40 = vld [vmem:[%s3324_s8 + $0x30] sm:$0xff] }
 0x35d   : > { %2297 = vrot.lane.b32.xlu1 %v2296_v15, %s2388_s24 }
 0x361   : > { %2302 = vrot.lane.b32.xlu1 %v2296_v15, %s2387_s23 }
 0x365   : > { %2307 = vrot.lane.b32.xlu1 %v2296_v15, %s2401_s14 }
 0x369   : > { %2312 = vrot.lane.b32.xlu1 %v2296_v15, %s2402_s15 }
 0x36d   : > { %2317 = vrot.lane.b32.xlu1 %v2296_v15, %s2403_s16 }
 0x371   : > { %2322 = vrot.lane.b32.xlu1 %v2296_v15, %s2390_s26  ;;  %s2409_s26 = smov 121  }
 0x375   : > { %2327 = vrot.lane.b32.xlu1 %v2296_v15, %s2405_s18 }
 0x379   : > { %1219 = vrot.lane.b32.xlu1 %v1164_v21, %s2400_s13  ;;  %s486_s13 = scalar_lea.vmem %s3327_s11, %s2526_s12 }
 0x37d   : > { %1228 = vperm.xlu1 %2331, %v3093_v43  }
 0x381   : > { %2333 = vset.pattern.permute.xlu1 %v2398_v50 }
 0x3cd   : > { %v1222_v16 = vpop.permute.xlu0 %1221 }
 0x3cf   : > { %v2298_v39 = vpop.permute.xlu1 %2297 }
 0x3d0   : > { %v2300_v41 = vunpack.i.h.bf16 %v2298_v39  ;;  %v2299_v42 = vunpack.i.l.bf16 %v2298_v39  ;;  %v1344_v39 = vld [vmem:[%s3324_s8 + $0x48] sm:$0xff] }
 0x3d2   : > { %v1177_v44 = vsel %vm511_vm0, %v2299_v42, %v2300_v41  ;;  %v1346_v41 = vld [vmem:[%s3324_s8 + $0x58] sm:$0xff] }
 0x3d3   : > { %v2109_v61 = vpack.c.bf16 %v1177_v44, %v1164_v21  ;;  %v2303_v22 = vpop.permute.xlu1 %2302  ;;  %v1339_v21 = vld [vmem:[%s3324_s8 + $0x20] sm:$0xff]  ;;  %v2128_v42 = vpack.c.bf16 %v1346_v41, %v1344_v39 }
 0x3d4   : > { %v2305_v62 = vunpack.i.h.bf16 %v2303_v22  ;;  %v2304_v23 = vunpack.i.l.bf16 %v2303_v22  ;;  %v2126_v15 = vpack.c.bf16 %v1341_v40, %v1339_v21  ;;  %v1343_v44 = vld [vmem:[%s3324_s8 + $0x40] sm:$0xff] }
 0x3d5   : > { %2110 = vmatpush3.bf16.msra.mxu1 %v2109_v61  ;;  %v1345_v61 = vld [vmem:[%s3324_s8 + $0x50] sm:$0xff] }
 0x3d6   : > { %2111 = vmatprep.subr.bf16.mxu1 %v2399_v11  ;;  %v1183_v35 = vsel %vm530_vm2, %v2304_v23, %v2305_v62  ;;  %v2130_v22 = vpack.c.bf16 %v1345_v61, %v1343_v44  ;;  %v1348_v62 = vld [vmem:[%s3324_s8 + $0x68] sm:$0xff]  ;;  %v1350_v23 = vld [vmem:[%s3324_s8 + $0x78] sm:$0xff] }
 0x3d7   : > { %v2308_v45 = vpop.permute.xlu1 %2307 }
 0x3d8   : > { %v2310_v46 = vunpack.i.h.bf16 %v2308_v45  ;;  %v2309_v34 = vunpack.i.l.bf16 %v2308_v45  ;;  %v2132_v45 = vpack.c.bf16 %v1350_v23, %v1348_v62 }
 0x3da   : > { %v1190_v36 = vsel %vm1189_vm10, %v2309_v34, %v2310_v46  ;;  %v1347_v46 = vld [vmem:[%s3324_s8 + $0x60] sm:$0xff]  ;;  %v1349_v34 = vld [vmem:[%s3324_s8 + $0x70] sm:$0xff] }
 0x3db   : > { %v2112_v38 = vpack.c.bf16 %v1190_v36, %v1183_v35  ;;  %v2313_v47 = vpop.permute.xlu1 %2312  ;;  %v2134_v35 = vpack.c.bf16 %v1349_v34, %v1347_v46  ;;  %v1352_v36 = vld [vmem:[%s3324_s8 + $0x88] sm:$0xff] }
 0x3dc   : > { %v2315_v51 = vunpack.i.h.bf16 %v2313_v47  ;;  %v2314_v53 = vunpack.i.l.bf16 %v2313_v47 }
 0x3dd   : > { %2113 = vmatpush3.bf16.msra.mxu1 %v2112_v38  ;;  %v1351_v38 = vld [vmem:[%s3324_s8 + $0x80] sm:$0xff] }
 0x3de   : > { %2114 = vmatprep.subr.bf16.mxu1 %v2399_v11  ;;  %v1197_v10 = vsel %vm1196_vm11, %v2314_v53, %v2315_v51  ;;  %v1353_v51 = vld [vmem:[%s3324_s8 + $0x90] sm:$0xff]  ;;  %v1358_v53 = vld [vmem:[%s3324_s8 + $0xb8] sm:$0xff] }
 0x3df   : > { %v2318_v54 = vpop.permute.xlu1 %2317 }
 0x3e0   : > { %v2320_v48 = vunpack.i.h.bf16 %v2318_v54  ;;  %v2319_v52 = vunpack.i.l.bf16 %v2318_v54  ;;  %v2138_v54 = vpack.c.bf16 %v1353_v51, %v1351_v38 }
 0x3e2   : > { %v1204_v57 = vsel %vm1203_vm12, %v2319_v52, %v2320_v48  ;;  %v1355_v52 = vld [vmem:[%s3324_s8 + $0xa0] sm:$0xff] }
 0x3e3   : > { %v2115_v58 = vpack.c.bf16 %v1204_v57, %v1197_v10  ;;  %v2323_v59 = vpop.permute.xlu1 %2322  ;;  %v1357_v10 = vld [vmem:[%s3324_s8 + $0xb0] sm:$0xff]  ;;  %v1360_v57 = vld [vmem:[%s3324_s8 + $0xc8] sm:$0xff] }
 0x3e4   : > { %v2325_v60 = vunpack.i.h.bf16 %v2323_v59  ;;  %v2324_v63 = vunpack.i.l.bf16 %v2323_v59  ;;  %v2142_v59 = vpack.c.bf16 %v1357_v10, %v1355_v52 }
 0x3e5   : > { %2116 = vmatpush3.bf16.msra.mxu1 %v2115_v58  ;;  %v1362_v58 = vld [vmem:[%s3324_s8 + $0xd8] sm:$0xff] }
 0x3e6   : > { %2117 = vmatprep.subr.bf16.mxu1 %v2399_v11  ;;  %v1210_v5 = vsel %vm587_vm3, %v2324_v63, %v2325_v60  ;;  %v2144_v60 = vpack.c.bf16 %v1362_v58, %v1360_v57  ;;  %v1359_v63 = vld [vmem:[%s3324_s8 + $0xc0] sm:$0xff]  ;;  %vm1492_vm3 = vcmask 949248  }
 0x3e7   : > { %v2328_v0 = vpop.permute.xlu1 %2327 }
 0x3e8   : > { %v2330_v2 = vunpack.i.h.bf16 %v2328_v0  ;;  %v2329_v3 = vunpack.i.l.bf16 %v2328_v0 }
 0x3ea   : > { %v1217_v7 = vsel %vm1216_vm13, %v2329_v3, %v2330_v2  ;;  %v1364_v2 = vld [vmem:[%s3324_s8 + $0xe8] sm:$0xff]  ;;  %v1366_v3 = vld [vmem:[%s3324_s8 + $0xf8] sm:$0xff] }
 0x3eb   : > { %v2118_v8 = vpack.c.bf16 %v1217_v7, %v1210_v5  ;;  %v1220_v14 = vpop.permute.xlu1 %1219  ;;  %v2148_v5 = vpack.c.bf16 %v1366_v3, %v1364_v2  ;;  %v1363_v7 = vld [vmem:[%s3324_s8 + $0xe0] sm:$0xff] }
 0x3ec   : > { %v1224_v19 = vsel %vm1223_vm14, %v1220_v14, %v1222_v16  ;;  %v1603_v3 = vld [vmem:[%s3325_s9] sm:$0xff] }
 0x3ed   : > { %2119 = vmatpush3.bf16.msra.mxu1 %v2118_v8  ;;  %v1365_v8 = vld [vmem:[%s3324_s8 + $0xf0] sm:$0xff] }
 0x3ee   : > { %1887 = vmatprep.subr.mxu1 %v2394_v6  ;;  %v2150_v14 = vpack.c.bf16 %v1365_v8, %v1363_v7  ;;  %v1575_v8 = vsub.s32 2, %v2749_v55  ;;  %v1606_v55 = vld [vmem:[%s3325_s9 + $0x18] sm:$0xff] }
 0x3f1   : > { %1888 = vmatpush3.msra.mxu1 %v1224_v19 }
 0x3f2   : > { %1890 = vmatmul.mubr.msk.f32.vlgmr.msra.gmra.mrb[4].mxu1 %vm658_vm8, %v1169_v17  ;;  %2121 = vmatprep.subr.bf16.mxu1 %v2120_v24 }
 0x3f3   : > { %1431 = vmatprep.mubr.f32.mxu1 %v2394_v6  ;;  %2123 = vmatpush1.bf16.msra.mxu1 %v2122_v1 }
 0x3f4   : > { %2125 = vmatprep.subr.bf16.mxu1 %v2124_v18 }
 0x3f7   : > { %2127 = vmatpush1.bf16.msra.mxu1 %v2126_v15 }
 0x3f8   : > { %2129 = vmatprep.subr.bf16.mxu1 %v2128_v42 }
 0x3fb   : > { %2131 = vmatpush1.bf16.msra.mxu1 %v2130_v22 }
 0x3fc   : > { %v1229_v26 = vpop.permute.xlu1 %1228  ;;  %2133 = vmatprep.subr.bf16.mxu1 %v2132_v45 }
 0x3ff   : > { %2135 = vmatpush1.bf16.msra.mxu1 %v2134_v35 }
 0x4c5   : > { %v1300_v28 = vpop.f32.mrb[4].mxu1 }
 0x4c6   : > { %v3125_v29 = vadd.f32 %v1300_v28, %v1229_v26  ;;  %v1891_v30 = vpop.f32.mrb[5].mxu1 }
 0x4c8   : > { %v1308_v31 = vmul.f32 %v1307_v27, %v3125_v29  ;;  %v1312_v32 = vmul.f32 %v3125_v29, %v3125_v29 }
 0x4ca   : > { %1309 = vadd.xlane.f32.xlu0 %v1308_v31  ;;  %v1313_v33 = vmul.f32 %v1312_v32, %v1307_v27 }
 0x4cc   : > { %1314 = vadd.xlane.f32.xlu1 %v1313_v33 }
 0x4dd   : > { %1330 = vperm.xlu1 %2333, %v3093_v43  }
 0x4e0   : > { %1325 = vperm.xlu0 %2332, %v3093_v43   ;;  %v1354_v43 = vld [vmem:[%s3324_s8 + $0x98] sm:$0xff] }
 0x4e1   : > { %2370 = vset.pattern.permute.xlu1 %v2397_v49  ;;  %v2136_v47 = vpack.c.bf16 %v1354_v43, %v1352_v36  ;;  %v1356_v49 = vld [vmem:[%s3324_s8 + $0xa8] sm:$0xff] }
 0x4e2   : > { %v2140_v48 = vpack.c.bf16 %v1358_v53, %v1356_v49 }
 0x4e3   : > { %2137 = vmatprep.subr.bf16.mxu1 %v2136_v47 }
 0x4e4   : > { %2369 = vset.pattern.permute.xlu0 %v2396_v9  ;;  %2139 = vmatpush1.bf16.msra.mxu1 %v2138_v54  ;;  %v1361_v9 = vld [vmem:[%s3324_s8 + $0xd0] sm:$0xff] }
 0x4e5   : > { %2141 = vmatprep.subr.bf16.mxu1 %v2140_v48  ;;  %v2146_v0 = vpack.c.bf16 %v1361_v9, %v1359_v63 }
 0x4e8   : > { %2143 = vmatpush1.bf16.msra.mxu1 %v2142_v59 }
 0x4e9   : > { %2145 = vmatprep.subr.bf16.mxu1 %v2144_v60 }
 0x4ec   : > { %2147 = vmatpush1.bf16.msra.mxu1 %v2146_v0  ;;  %v1438_v0 = vld [vmem:[%s478_s28] sm:$0xff] }
 0x4ed   : > { %2149 = vmatprep.subr.bf16.mxu1 %v2148_v5  ;;  %v1604_v5 = vld [vmem:[%s3325_s9 + $0x8] sm:$0xff] }
 0x4ee   : > { %v2165_v7 = vpack.c.bf16 %v1604_v5, %v1603_v3 }
 0x4f0   : > { %2151 = vmatpush1.bf16.msra.mxu1 %v2150_v14 }
 0x4f1   : > { %2152 = vmatprep.subr.bf16.mxu1 %v2399_v11 }
 0x557   : > { %v1310_v16 = vpop.xlane.xlu0 %1309 }
 0x558   : > { %v1311_v17 = vmul.f32 0.013888889, %v1310_v16  ;;  %v2378_v16 = vld [vmem:[%s3326_s10] sm:$0x77] }
 0x559   : > { %v1315_v19 = vpop.xlane.xlu1 %1314 }
 0x55a   : > { %v1317_v20 = vmul.f32 %v1311_v17, %v1311_v17  ;;  %v1316_v12 = vmul.f32 0.013888889, %v1315_v19  ;;  %v1320_v1 = vsub.f32 %v3125_v29, %v1311_v17  ;;  %v3229_v29 = vld [vmem:[%s482_s27] sm:$0xff] }
 0x55c   : > { %v1318_v13 = vsub.f32 %v1316_v12, %v1317_v20 }
 0x55d   : > { %v1331_v28 = vpop.permute.xlu1 %1330 }
 0x55e   : > { %v1319_v24 = vmax.f32 %v1318_v13, 0.0 }
 0x55f   : > { %v1326_v26 = vpop.permute.xlu0 %1325 }
 0x560   : > { %v1321_v4 = vadd.f32 1e-05, %v1319_v24 }
 0x562   : > { %2374 = vrsqrt.f32 %v1321_v4  ;;  %v1605_v4 = vld [vmem:[%s3325_s9 + $0x10] sm:$0xff] }
 0x56c   : > { %v2375_v25 = vpop.eup %2374 }
 0x56d   : > { %v1323_v27 = vmul.f32 %v2375_v25, %v1320_v1  ;;  %v2168_v1 = vpack.c.bf16 %v1606_v55, %v1605_v4  ;;  %v1607_v25 = vld [vmem:[%s3325_s9 + $0x20] sm:$0xff] }
 0x56f   : > { %v1328_v30 = vmul.f32 %v1326_v26, %v1323_v27  ;;  %v1608_v26 = vld [vmem:[%s3325_s9 + $0x28] sm:$0xff] }
 0x570   : > { %v2171_v27 = vpack.c.bf16 %v1608_v26, %v1607_v25 }
 0x571   : > { %v1333_v31 = vadd.f32 %v1331_v28, %v1328_v30  ;;  %v1609_v28 = vld [vmem:[%s3325_s9 + $0x30] sm:$0xff]  ;;  %v1610_v30 = vld [vmem:[%s3325_s9 + $0x38] sm:$0xff] }
 0x573   : > { %v1334_v32 = vmax.f32 %v1333_v31, 0.0  ;;  %v2174_v31 = vpack.c.bf16 %v1610_v30, %v1609_v28 }
 0x575   : > { %1432 = vmatmul.mubr.f32.vlgmr.msra.gmra.mrb[6].mxu1 %v1334_v32  ;;  %v1611_v32 = vld [vmem:[%s3325_s9 + $0x40] sm:$0xff] }
 0x576   : > { %1910 = vmatprep.mubr.msk.f32.mxu1 %vm2404_vm9, %v2394_v6 }
 0x648   : > { %v1433_v33 = vpop.f32.mrb[6].mxu1 }
 0x649   : > { %v1435_v37 = vpop.f32.mrb[7].mxu1 }
 0x64a   : > { %v2359_v56 = vpack.i.bf16 %v1435_v37, %v1433_v33 }
 0x64c   : > { %2360 = vrot.lane.b32.xlu0 %v2359_v56, %s2403_s16  ;;  %2335 = vrot.lane.b32.xlu1 %v2359_v56, %s2388_s24  ;;  %s2410_s16 = smov 117  }
 0x650   : > { %1488 = vrot.lane.b32.xlu0 %v1433_v33, %s2406_s19  ;;  %2340 = vrot.lane.b32.xlu1 %v2359_v56, %s2387_s23 }
 0x654   : > { %2345 = vrot.lane.b32.xlu1 %v2359_v56, %s2407_s20  ;;  %1497 = vperm.xlu0 %2369, %v3229_v29  }
 0x658   : > { %2350 = vrot.lane.b32.xlu1 %v2359_v56, %s2408_s21  ;;  %2371 = vset.pattern.permute.xlu0 %v2398_v50 }
 0x65c   : > { %2355 = vrot.lane.b32.xlu1 %v2359_v56, %s2409_s26 }
 0x660   : > { %2365 = vrot.lane.b32.xlu1 %v2359_v56, %s2410_s16 }
 0x664   : > { %1490 = vrot.lane.b32.xlu1 %v1435_v37, %s2406_s19  ;;  %v1613_v37 = vld [vmem:[%s3325_s9 + $0x50] sm:$0xff] }
 0x6be   : > { %v2336_v18 = vpop.permute.xlu1 %2335  ;;  %v2361_v36 = vpop.permute.xlu0 %2360 }
 0x6bf   : > { %v2338_v21 = vunpack.i.h.bf16 %v2336_v18  ;;  %v2337_v40 = vunpack.i.l.bf16 %v2336_v18  ;;  %v2363_v51 = vunpack.i.h.bf16 %v2361_v36  ;;  %v2362_v49 = vunpack.i.l.bf16 %v2361_v36  ;;  %v1614_v18 = vld [vmem:[%s3325_s9 + $0x58] sm:$0xff] }
 0x6c1   : > { %v1446_v15 = vsel %vm511_vm0, %v2337_v40, %v2338_v21  ;;  %vm1465_vm0 = vcmask 998400   ;;  %v1479_v58 = vsel %vm1203_vm12, %v2362_v49, %v2363_v51  ;;  %v1615_v21 = vld [vmem:[%s3325_s9 + $0x60] sm:$0xff]  ;;  %v1616_v40 = vld [vmem:[%s3325_s9 + $0x68] sm:$0xff] }
 0x6c2   : > { %v2153_v39 = vpack.c.bf16 %v1446_v15, %v1433_v33  ;;  %v2341_v41 = vpop.permute.xlu1 %2340  ;;  %v1489_v9 = vpop.permute.xlu0 %1488  ;;  %v1612_v33 = vld [vmem:[%s3325_s9 + $0x48] sm:$0xff]  ;;  %v2183_v15 = vpack.c.bf16 %v1616_v40, %v1615_v21 }
 0x6c3   : > { %v2343_v42 = vunpack.i.h.bf16 %v2341_v41  ;;  %v2342_v44 = vunpack.i.l.bf16 %v2341_v41  ;;  %v2177_v56 = vpack.c.bf16 %v1612_v33, %v1611_v32  ;;  %v1618_v41 = vld [vmem:[%s3325_s9 + $0x78] sm:$0xff] }
 0x6c4   : > { %2154 = vmatpush3.bf16.msra.mxu1 %v2153_v39  ;;  %v1617_v39 = vld [vmem:[%s3325_s9 + $0x70] sm:$0xff] }
 0x6c5   : > { %2155 = vmatprep.subr.bf16.mxu1 %v2399_v11  ;;  %v1452_v23 = vsel %vm530_vm2, %v2342_v44, %v2343_v42  ;;  %vm1485_vm2 = vcmask 957440   ;;  %v2186_v42 = vpack.c.bf16 %v1618_v41, %v1617_v39 }
 0x6c6   : > { %v2346_v61 = vpop.permute.xlu1 %2345 }
 0x6c7   : > { %v2348_v22 = vunpack.i.h.bf16 %v2346_v61  ;;  %v2347_v62 = vunpack.i.l.bf16 %v2346_v61 }
 0x6c9   : > { %v1459_v50 = vsel %vm1458_vm15, %v2347_v62, %v2348_v22 }
 0x6ca   : > { %v2156_v45 = vpack.c.bf16 %v1459_v50, %v1452_v23  ;;  %v2351_v46 = vpop.permute.xlu1 %2350 }
 0x6cb   : > { %v2353_v34 = vunpack.i.h.bf16 %v2351_v46  ;;  %v2352_v35 = vunpack.i.l.bf16 %v2351_v46 }
 0x6cc   : > { %2157 = vmatpush3.bf16.msra.mxu1 %v2156_v45 }
 0x6cd   : > { %2158 = vmatprep.subr.bf16.mxu1 %v2399_v11  ;;  %v1466_v53 = vsel %vm1465_vm0, %v2352_v35, %v2353_v34 }
 0x6ce   : > { %v2356_v43 = vpop.permute.xlu1 %2355 }
 0x6cf   : > { %v2358_v38 = vunpack.i.h.bf16 %v2356_v43  ;;  %v2357_v47 = vunpack.i.l.bf16 %v2356_v43 }
 0x6d1   : > { %v1473_v54 = vsel %vm1472_vm1, %v2357_v47, %v2358_v38 }
 0x6d2   : > { %v2159_v48 = vpack.c.bf16 %v1473_v54, %v1466_v53  ;;  %v2366_v52 = vpop.permute.xlu1 %2365 }
 0x6d3   : > { %v2368_v10 = vunpack.i.h.bf16 %v2366_v52  ;;  %v2367_v57 = vunpack.i.l.bf16 %v2366_v52  ;;  %v1498_v14 = vpop.permute.xlu0 %1497 }
 0x6d4   : > { %2160 = vmatpush3.bf16.msra.mxu1 %v2159_v48 }
 0x6d5   : > { %v1486_v59 = vsel %vm1485_vm2, %v2367_v57, %v2368_v10  ;;  %2161 = vmatprep.subr.bf16.mxu1 %v2399_v11 }
 0x6d6   : > { %v2162_v60 = vpack.c.bf16 %v1486_v59, %v1479_v58  ;;  %v1491_v63 = vpop.permute.xlu1 %1490 }
 0x6d7   : > { %v1493_v2 = vsel %vm1492_vm3, %v1489_v9, %v1491_v63 }
 0x6d8   : > { %2163 = vmatpush3.bf16.msra.mxu1 %v2162_v60 }
 0x6d9   : > { %1908 = vmatprep.subr.mxu1 %v2394_v6 }
 0x6dc   : > { %1909 = vmatpush3.msra.mxu1 %v1493_v2 }
 0x6dd   : > { %1911 = vmatmul.mubr.msk.f32.vlgmr.msra.gmra.mrb[8].mxu1 %vm658_vm8, %v1438_v0  ;;  %2164 = vmatprep.subr.bf16.mxu1 %v2399_v11 }
 0x6de   : > { %1945 = vmatprep.mubr.msk.f32.mxu1 %vm2404_vm9, %v2394_v6  ;;  %2166 = vmatpush3.bf16.msra.mxu1 %v2165_v7  ;;  %v1576_v6 = vrot.slane %v2378_v16, %v1575_v8 }
 0x6df   : > { %2167 = vmatprep.subr.bf16.mxu1 %v2399_v11 }
 0x6e2   : > { %2169 = vmatpush3.bf16.msra.mxu1 %v2168_v1 }
 0x6e3   : > { %2170 = vmatprep.subr.bf16.mxu1 %v2399_v11 }
 0x6e6   : > { %2172 = vmatpush3.bf16.msra.mxu1 %v2171_v27 }
 0x6e7   : > { %2173 = vmatprep.subr.bf16.mxu1 %v2399_v11 }
 0x6ea   : > { %2175 = vmatpush3.bf16.msra.mxu1 %v2174_v31 }
 0x6eb   : > { %2176 = vmatprep.subr.bf16.mxu1 %v2399_v11 }
 0x6ee   : > { %2178 = vmatpush3.bf16.msra.mxu1 %v2177_v56 }
 0x6ef   : > { %2179 = vmatprep.subr.bf16.mxu1 %v2399_v11 }
 0x7b0   : > { %v1569_v17 = vpop.f32.mrb[8].mxu1 }
 0x7b1   : > { %v1570_v19 = vadd.f32 %v1569_v17, %v1498_v14  ;;  %v1912_v20 = vpop.f32.mrb[9].mxu1 }
 0x7b3   : > { %v1577_v12 = vmul.f32 %v1576_v6, %v1570_v19  ;;  %v1581_v13 = vmul.f32 %v1570_v19, %v1570_v19 }
 0x7b5   : > { %1578 = vadd.xlane.f32.xlu1 %v1577_v12  ;;  %v1582_v24 = vmul.f32 %v1581_v13, %v1576_v6 }
 0x7b7   : > { %1583 = vadd.xlane.f32.xlu0 %v1582_v24 }
 0x7c6   : > { %1594 = vperm.xlu1 %2370, %v3229_v29  }
 0x7cd   : > { %1599 = vperm.xlu0 %2371, %v3229_v29   ;;  %v2180_v29 = vpack.c.bf16 %v1614_v18, %v1613_v37 }
 0x7cf   : > { %2181 = vmatpush3.bf16.msra.mxu1 %v2180_v29 }
 0x7d0   : > { %2182 = vmatprep.subr.bf16.mxu1 %v2399_v11 }
 0x7d3   : > { %2184 = vmatpush3.bf16.msra.mxu1 %v2183_v15 }
 0x7d4   : > { %2185 = vmatprep.subr.bf16.mxu1 %v2399_v11 }
 0x7d7   : > { %2187 = vmatpush3.bf16.msra.mxu1 %v2186_v42 }
 0x842   : > { %v1579_v44 = vpop.xlane.xlu1 %1578 }
 0x843   : > { %v1580_v61 = vmul.f32 0.055555556, %v1579_v44 }
 0x844   : > { %v1584_v22 = vpop.xlane.xlu0 %1583 }
 0x845   : > { %v1586_v62 = vmul.f32 %v1580_v61, %v1580_v61  ;;  %v1585_v23 = vmul.f32 0.055555556, %v1584_v22  ;;  %v1589_v11 = vsub.f32 %v1570_v19, %v1580_v61 }
 0x846   : > { %v1595_v35 = vpop.permute.xlu1 %1594 }
 0x847   : > { %v1587_v50 = vsub.f32 %v1585_v23, %v1586_v62 }
 0x849   : > { %v1588_v45 = vmax.f32 %v1587_v50, 0.0 }
 0x84b   : > { %v1590_v46 = vadd.f32 1e-05, %v1588_v45 }
 0x84c   : > { %v1600_v43 = vpop.permute.xlu0 %1599 }
 0x84d   : > { %2376 = vrsqrt.f32 %v1590_v46 }
 0x857   : > { %v2377_v34 = vpop.eup %2376 }
 0x858   : > { %v1592_v36 = vmul.f32 %v2377_v34, %v1589_v11 }
 0x85a   : > { %v1597_v38 = vmul.f32 %v1595_v35, %v1592_v36 }
 0x85c   : > { %v1602_v47 = vadd.f32 %v1600_v43, %v1597_v38 }
 0x85e   : > { %1946 = vmatmul.mubr.f32.vlgmr.msra.gmra.mrb[10].mxu1 %v1602_v47 }
 0x931   : > { %v1685_v51 = vpop.f32.mrb[10].mxu1 }
 0x932   : > { %1689 = vst [vmem:[%s486_s13] sm:$0xff] %v1685_v51  ;;  %v1947_v49 = vpop.f32.mrb[11].mxu1 }
 0x933 PF: > { %s21_s17 = sadd.s32 1, %s2385_s17  }
 0x934   : > { %p18_p4 = scmp.ge.s32.totalorder %s21_s17, 4  }
 0x936   :  { %20 = sbr.rel (!%p18_p4) target bundleno = 1 (0x1), region = 112 }

</bundles_post_ra>
